<compile_context>
chip_gen: v5e
topology: v5e:2x2
jax: 0.10.0
libtpu: 0.0.40
codegen_flags: <defaults>
</compile_context>

<pallas_src>
import jax
import jax.numpy as jnp
import numpy as np
from jax.experimental import pallas as pl
from jax.experimental.pallas import tpu as pltpu


def _lstm_kernel(xp_ref, whh_ref, h0_ref, c0_ref,
                 out_ref, hn_ref, cn_ref,
                 h_scr, c_scr):
    """One grid step processes a chunk of T timesteps.

    xp_ref : (B, T, 4H) f32   precomputed x_t @ W_ih^T + (b_ih + b_hh),
                              gate columns ordered (i, f, o, g), g pre-scaled x2
    whh_ref: (H, 4H)    bf16  recurrent weight (grid-invariant, single-buffered)
    h0/c0  : (B, H)     f32   initial state (grid-invariant)
    out_ref: (B, T*H)   f32   lane-dense hidden outputs for this time chunk
    hn/cn  : (B, H)     f32   final state (resident accumulator outputs: written
                              ONLY on the last grid step — intermediate grid
                              steps never write these blocks by design)
    h_scr/c_scr: (B, H) f32   state carried across grid steps
    """
    H = h_scr.shape[-1]
    T = xp_ref.shape[1]
    t = pl.program_id(0)

    # Initialize carried state on the first chunk.
    @pl.when(t == 0)
    def _():
        h_scr[...] = h0_ref[...]
        c_scr[...] = c0_ref[...]

    whh = whh_ref[...]          # (H, 4H) bf16, hoisted out of the step loop

    h = h_scr[...]
    c = c_scr[...]

    # Static full unroll: T is small here.  For non-toy T, switch to
    # lax.fori_loop with a partial unroll factor to bound code size / vreg
    # live ranges (review item on partial unroll).
    for s in range(T):
        # Per-step streamed operand loaded inside the loop (keeps VMEM live
        # ranges short); only the recurrent matmul sits on the serial chain.
        gates = xp_ref[:, s, :] + jnp.dot(
            h.astype(jnp.bfloat16), whh, preferred_element_type=jnp.float32)

        # One EUP pass over all 4H lanes: columns are (i, f, o, g') with
        # g' = 2*g_pre, so tanh(g_pre) == 2*sigmoid(g') - 1.
        sig = jax.nn.sigmoid(gates)
        i_g = sig[:, 0 * H:1 * H]
        f_g = sig[:, 1 * H:2 * H]
        o_g = sig[:, 2 * H:3 * H]
        g_g = 2.0 * sig[:, 3 * H:4 * H] - 1.0

        c = f_g * c + i_g * g_g
        h = o_g * jnp.tanh(c)

        # Static lane-offset store into the lane-dense (B, T*H) output slab.
        out_ref[:, s * H:(s + 1) * H] = h.astype(out_ref.dtype)

    h_scr[...] = h
    c_scr[...] = c

    # Final-state outputs are resident accumulators; write them once, at the end.
    @pl.when(t == pl.num_programs(0) - 1)
    def _():
        hn_ref[...] = h.astype(hn_ref.dtype)
        cn_ref[...] = c.astype(cn_ref.dtype)


def _pick_time_chunk(N, cap=32):
    """Time-chunk length per grid step.

    Prefer a divisor of N (<= cap) that is a multiple of 8 so the (T, 4H)
    minor dims of the xp block satisfy the (8,128) tiling rule; otherwise fall
    back to the full sequence in one grid step (full-extent blocks are always
    legal).  For non-toy N, sweep `cap`.
    """
    for cand in range(min(N, cap), 0, -1):
        if N % cand == 0 and cand % 8 == 0:
            return cand
    return N


def _prep_gate_params(w_ih, w_hh, b_ih, b_hh, H):
    """Reorder PyTorch gate rows (i,f,g,o) -> (i,f,o,g) and pre-scale g by 2."""
    perm = np.concatenate([np.arange(0, H), np.arange(H, 2 * H),
                           np.arange(3 * H, 4 * H), np.arange(2 * H, 3 * H)])
    scale = np.concatenate([np.ones(3 * H, np.float32),
                            np.full(H, 2.0, np.float32)])
    w_ih_p = w_ih[perm] * scale[:, None]          # (4H, I)
    w_hh_p = w_hh[perm] * scale[:, None]          # (4H, H)
    bias_p = (b_ih + b_hh)[perm] * scale          # (4H,)
    return w_ih_p, w_hh_p, bias_p


def viewer_forward(view, params):
    """view: (B, N, P+1) f32. Returns (outputs (N,B,H), (h_n (1,B,H), c_n (1,B,H)))."""
    w_ih, w_hh, b_ih, b_hh, h0, c0 = (params["w_ih"], params["w_hh"],
                                      params["b_ih"], params["b_hh"],
                                      params["h0"], params["c0"])
    B, N, I = view.shape
    H = h0.shape[-1]
    G = 4 * H

    # ---- glue in plain JAX --------------------------------------------------
    w_ih_p, w_hh_p, bias_p = _prep_gate_params(w_ih, w_hh, b_ih, b_hh, H)

    # Hoisted input projection for ALL timesteps as ONE explicit 2-D GEMM
    # (lane-dense MXU path, no batched dot_general, no transposes).
    xp2d = (view.reshape(B * N, I).astype(jnp.float32)
            @ w_ih_p.T.astype(jnp.float32)) + bias_p.astype(jnp.float32)
    xp = xp2d.reshape(B, N, G)                                  # (B, N, 4H) f32

    whh_t = w_hh_p.T.astype(jnp.bfloat16)                       # (H, 4H) bf16
    h0_b = jnp.broadcast_to(h0[0], (B, H)).astype(jnp.float32)  # (B, H)
    c0_b = jnp.broadcast_to(c0[0], (B, H)).astype(jnp.float32)  # (B, H)

    T = _pick_time_chunk(N)
    grid = (N // T,)

    grid_spec = pltpu.PrefetchScalarGridSpec(
        num_scalar_prefetch=0,
        grid=grid,
        in_specs=[
            # streamed per-chunk projected input (double-buffered by default)
            pl.BlockSpec((B, T, G), lambda t: (0, t, 0)),
            # grid-invariant blocks: single-buffered (review: Buffered(1))
            pl.BlockSpec((H, G), lambda t: (0, 0),
                         pipeline_mode=pl.Buffered(1)),
            pl.BlockSpec((B, H), lambda t: (0, 0),
                         pipeline_mode=pl.Buffered(1)),
            pl.BlockSpec((B, H), lambda t: (0, 0),
                         pipeline_mode=pl.Buffered(1)),
        ],
        out_specs=[
            pl.BlockSpec((B, T * H), lambda t: (0, t)),  # lane-dense outputs
            pl.BlockSpec((B, H), lambda t: (0, 0)),      # h_n (resident)
            pl.BlockSpec((B, H), lambda t: (0, 0)),      # c_n (resident)
        ],
        scratch_shapes=[
            pltpu.VMEM((B, H), jnp.float32),             # h carry
            pltpu.VMEM((B, H), jnp.float32),             # c carry
        ],
    )

    out2d, h_n, c_n = pl.pallas_call(
        _lstm_kernel,
        out_shape=(
            jax.ShapeDtypeStruct((B, N * H), jnp.float32),
            jax.ShapeDtypeStruct((B, H), jnp.float32),
            jax.ShapeDtypeStruct((B, H), jnp.float32),
        ),
        grid_spec=grid_spec,
        compiler_params=pltpu.CompilerParams(
            # Time is a true sequential recurrence.  On v7x one could add a
            # leading "parallel" batch axis to use the second TensorCore; at
            # B=2 with sub-8 batch blocks it is skipped here.
            dimension_semantics=("arbitrary",),
        ),
    )(xp, whh_t, h0_b, c0_b)

    # Layout plumbing only: (B, N*H) -> (N, B, H).
    outputs = jnp.transpose(out2d.reshape(B, N, H), (1, 0, 2)).astype(view.dtype)
    return outputs, (h_n[None, ...].astype(view.dtype),
                     c_n[None, ...].astype(view.dtype))


def _reference_forward(view, params):
    """Pure-JAX f32 reference of torch.nn.LSTM semantics for validation."""
    w_ih, w_hh, b_ih, b_hh, h0, c0 = (params["w_ih"], params["w_hh"],
                                      params["b_ih"], params["b_hh"],
                                      params["h0"], params["c0"])
    B, N, I = view.shape
    H = h0.shape[-1]
    x = jnp.transpose(view, (1, 0, 2))
    h = jnp.broadcast_to(h0[0], (B, H))
    c = jnp.broadcast_to(c0[0], (B, H))
    outs = []
    for t in range(N):
        gates = x[t] @ w_ih.T + h @ w_hh.T + (b_ih + b_hh)
        i_g = jax.nn.sigmoid(gates[:, 0 * H:1 * H])
        f_g = jax.nn.sigmoid(gates[:, 1 * H:2 * H])
        g_g = jnp.tanh(gates[:, 2 * H:3 * H])
        o_g = jax.nn.sigmoid(gates[:, 3 * H:4 * H])
        c = f_g * c + i_g * g_g
        h = o_g * jnp.tanh(c)
        outs.append(h)
    return jnp.stack(outs, 0), (h[None], c[None])


def init_params(key, P, H):
    I = P + 1
    k = jax.random.split(key, 6)
    s = 1.0 / np.sqrt(H)
    return {
        "w_ih": jax.random.uniform(k[0], (4 * H, I), jnp.float32, -s, s),
        "w_hh": jax.random.uniform(k[1], (4 * H, H), jnp.float32, -s, s),
        "b_ih": jax.random.uniform(k[2], (4 * H,), jnp.float32, -s, s),
        "b_hh": jax.random.uniform(k[3], (4 * H,), jnp.float32, -s, s),
        "h0": jax.random.normal(k[4], (1, 1, H), jnp.float32),
        "c0": jax.random.normal(k[5], (1, 1, H), jnp.float32),
    }


if __name__ == "__main__":
    P, H = 15, 32          # input feature size = P + 1 = 16, hidden = 32
    B, N = 2, 8            # batch = 2, sequence length = 8

    key = jax.random.PRNGKey(0)
    pkey, xkey = jax.random.split(key)
    params = init_params(pkey, P, H)
    view = jax.random.normal(xkey, (B, N, P + 1), jnp.float32)

    outputs, (h_n, c_n) = viewer_forward(view, params)
    jax.block_until_ready((outputs, h_n, c_n))

    ref_out, (ref_h, ref_c) = _reference_forward(view, params)
    # Tolerance loosened vs the f32 reference because the recurrent matmul
    # feeds bf16 operands to the MXU (f32 accumulation) per the perf review.
    np.testing.assert_allclose(np.asarray(outputs), np.asarray(ref_out),
                               rtol=3e-2, atol=3e-2)
    np.testing.assert_allclose(np.asarray(h_n), np.asarray(ref_h),
                               rtol=3e-2, atol=3e-2)
    np.testing.assert_allclose(np.asarray(c_n), np.asarray(ref_c),
                               rtol=3e-2, atol=3e-2)

    assert outputs.shape == (N, B, H)
    assert h_n.shape == (1, B, H) and c_n.shape == (1, B, H)
    print("KERNEL_OK")
</pallas_src>

<mosaic_0001>
module attributes {stable_mosaic.version = 11 : i64} {
  func.func @_lstm_kernel(%arg0: i32, %arg1: memref<2x8x128xf32, #tpu.memory_space<vmem>>, %arg2: memref<32x128xbf16, #tpu.memory_space<vmem>>, %arg3: memref<2x32xf32, #tpu.memory_space<vmem>>, %arg4: memref<2x32xf32, #tpu.memory_space<vmem>>, %arg5: memref<2x256xf32, #tpu.memory_space<vmem>>, %arg6: memref<2x32xf32, #tpu.memory_space<vmem>>, %arg7: memref<2x32xf32, #tpu.memory_space<vmem>>, %arg8: memref<2x32xf32, #tpu.memory_space<vmem>>, %arg9: memref<2x32xf32, #tpu.memory_space<vmem>>) attributes {dimension_semantics = [#tpu.dimension_semantics<arbitrary>], iteration_bounds = array<i64: 1>, scalar_prefetch = 0 : i64, scratch_operands = 2 : i64, tpu.core_type = #tpu.core_type<tc>, window_params = [{transform_indices = @transform_0, window_bounds = array<i64: 2, 8, 128>}, {pipeline_mode = #tpu.pipeline_mode<synchronous>, transform_indices = @transform_1, window_bounds = array<i64: 32, 128>}, {pipeline_mode = #tpu.pipeline_mode<synchronous>, transform_indices = @transform_2, window_bounds = array<i64: 2, 32>}, {pipeline_mode = #tpu.pipeline_mode<synchronous>, transform_indices = @transform_3, window_bounds = array<i64: 2, 32>}, {transform_indices = @transform_4, window_bounds = array<i64: 2, 256>}, {pipeline_mode = #tpu.pipeline_mode<synchronous>, transform_indices = @transform_5, window_bounds = array<i64: 2, 32>}, {pipeline_mode = #tpu.pipeline_mode<synchronous>, transform_indices = @transform_6, window_bounds = array<i64: 2, 32>}]} {
    %c0_i32 = arith.constant 0 : i32
    %0 = arith.cmpi eq, %arg0, %c0_i32 : i32
    %1 = arith.extui %0 : i1 to i32
    %c0_i32_0 = arith.constant 0 : i32
    %2 = arith.cmpi ne, %1, %c0_i32_0 : i32
    scf.if %2 {
      %c0_69 = arith.constant 0 : index
      %c0_70 = arith.constant 0 : index
      %203 = vector.load %arg3[%c0_69, %c0_70] : memref<2x32xf32, #tpu.memory_space<vmem>>, vector<2x32xf32>
      %c0_71 = arith.constant 0 : index
      %c0_72 = arith.constant 0 : index
      %204 = vector.load %arg8[%c0_71, %c0_72] : memref<2x32xf32, #tpu.memory_space<vmem>>, vector<2x32xf32>
      tpu.vector_store %arg8[%c0_71, %c0_72], %203 {strides = array<i32>} : memref<2x32xf32, #tpu.memory_space<vmem>>, vector<2x32xf32>,
      %c0_73 = arith.constant 0 : index
      %c0_74 = arith.constant 0 : index
      %205 = vector.load %arg4[%c0_73, %c0_74] : memref<2x32xf32, #tpu.memory_space<vmem>>, vector<2x32xf32>
      %c0_75 = arith.constant 0 : index
      %c0_76 = arith.constant 0 : index
      %206 = vector.load %arg9[%c0_75, %c0_76] : memref<2x32xf32, #tpu.memory_space<vmem>>, vector<2x32xf32>
      tpu.vector_store %arg9[%c0_75, %c0_76], %205 {strides = array<i32>} : memref<2x32xf32, #tpu.memory_space<vmem>>, vector<2x32xf32>,
    } else {
    }
    %c0 = arith.constant 0 : index
    %c0_1 = arith.constant 0 : index
    %3 = vector.load %arg2[%c0, %c0_1] : memref<32x128xbf16, #tpu.memory_space<vmem>>, vector<32x128xbf16>
    %c0_2 = arith.constant 0 : index
    %c0_3 = arith.constant 0 : index
    %4 = vector.load %arg8[%c0_2, %c0_3] : memref<2x32xf32, #tpu.memory_space<vmem>>, vector<2x32xf32>
    %c0_4 = arith.constant 0 : index
    %c0_5 = arith.constant 0 : index
    %5 = vector.load %arg9[%c0_4, %c0_5] : memref<2x32xf32, #tpu.memory_space<vmem>>, vector<2x32xf32>
    %c0_6 = arith.constant 0 : index
    %c0_7 = arith.constant 0 : index
    %c0_8 = arith.constant 0 : index
    %6 = vector.load %arg1[%c0_6, %c0_7, %c0_8] : memref<2x8x128xf32, #tpu.memory_space<vmem>>, vector<2x1x128xf32>
    %7 = vector.shape_cast %6 : vector<2x1x128xf32> to vector<2x128xf32>
    %8 = arith.truncf %4 : vector<2x32xf32> to vector<2x32xbf16>
    %cst = arith.constant dense<0.000000e+00> : vector<2x128xf32>
    %9 = tpu.matmul %8, %3, %cst {dimension_numbers = #tpu.dot_dimension_numbers<[1], [0], [0], [1], [0, 0, 1, 1], [], []>} : vector<2x32xbf16>, vector<32x128xbf16>, vector<2x128xf32> -> vector<2x128xf32>
    %10 = arith.addf %7, %9 : vector<2x128xf32>
    %11 = arith.negf %10 : vector<2x128xf32>
    %12 = math.exp %11 : vector<2x128xf32>
    %cst_9 = arith.constant 1.000000e+00 : f32
    %13 = vector.broadcast %cst_9 : f32 to vector<2x128xf32>
    %14 = arith.addf %13, %12 : vector<2x128xf32>
    %15 = arith.divf %13, %14 : vector<2x128xf32>
    %16 = vector.extract_strided_slice %15 {offsets = [0, 0], sizes = [2, 32], strides = [1, 1]} : vector<2x128xf32> to vector<2x32xf32>
    %17 = vector.extract_strided_slice %15 {offsets = [0, 32], sizes = [2, 32], strides = [1, 1]} : vector<2x128xf32> to vector<2x32xf32>
    %18 = vector.extract_strided_slice %15 {offsets = [0, 64], sizes = [2, 32], strides = [1, 1]} : vector<2x128xf32> to vector<2x32xf32>
    %19 = vector.extract_strided_slice %15 {offsets = [0, 96], sizes = [2, 32], strides = [1, 1]} : vector<2x128xf32> to vector<2x32xf32>
    %cst_10 = arith.constant 2.000000e+00 : f32
    %20 = vector.broadcast %cst_10 : f32 to vector<2x32xf32>
    %21 = arith.mulf %20, %19 : vector<2x32xf32>
    %cst_11 = arith.constant 1.000000e+00 : f32
    %22 = vector.broadcast %cst_11 : f32 to vector<2x32xf32>
    %23 = arith.subf %21, %22 : vector<2x32xf32>
    %24 = arith.mulf %17, %5 : vector<2x32xf32>
    %25 = arith.mulf %16, %23 : vector<2x32xf32>
    %26 = arith.addf %24, %25 : vector<2x32xf32>
    %27 = math.tanh %26 : vector<2x32xf32>
    %28 = arith.mulf %18, %27 : vector<2x32xf32>
    %c0_12 = arith.constant 0 : index
    %c0_13 = arith.constant 0 : index
    %29 = vector.load %arg5[%c0_12, %c0_13] : memref<2x256xf32, #tpu.memory_space<vmem>>, vector<2x32xf32>
    tpu.vector_store %arg5[%c0_12, %c0_13], %28 {strides = array<i32>} : memref<2x256xf32, #tpu.memory_space<vmem>>, vector<2x32xf32>,
    %c0_14 = arith.constant 0 : index
    %c1 = arith.constant 1 : index
    %c0_15 = arith.constant 0 : index
    %30 = vector.load %arg1[%c0_14, %c1, %c0_15] : memref<2x8x128xf32, #tpu.memory_space<vmem>>, vector<2x1x128xf32>
    %31 = vector.shape_cast %30 : vector<2x1x128xf32> to vector<2x128xf32>
    %32 = arith.truncf %28 : vector<2x32xf32> to vector<2x32xbf16>
    %cst_16 = arith.constant dense<0.000000e+00> : vector<2x128xf32>
    %33 = tpu.matmul %32, %3, %cst_16 {dimension_numbers = #tpu.dot_dimension_numbers<[1], [0], [0], [1], [0, 0, 1, 1], [], []>} : vector<2x32xbf16>, vector<32x128xbf16>, vector<2x128xf32> -> vector<2x128xf32>
    %34 = arith.addf %31, %33 : vector<2x128xf32>
    %35 = arith.negf %34 : vector<2x128xf32>
    %36 = math.exp %35 : vector<2x128xf32>
    %cst_17 = arith.constant 1.000000e+00 : f32
    %37 = vector.broadcast %cst_17 : f32 to vector<2x128xf32>
    %38 = arith.addf %37, %36 : vector<2x128xf32>
    %39 = arith.divf %37, %38 : vector<2x128xf32>
    %40 = vector.extract_strided_slice %39 {offsets = [0, 0], sizes = [2, 32], strides = [1, 1]} : vector<2x128xf32> to vector<2x32xf32>
    %41 = vector.extract_strided_slice %39 {offsets = [0, 32], sizes = [2, 32], strides = [1, 1]} : vector<2x128xf32> to vector<2x32xf32>
    %42 = vector.extract_strided_slice %39 {offsets = [0, 64], sizes = [2, 32], strides = [1, 1]} : vector<2x128xf32> to vector<2x32xf32>
    %43 = vector.extract_strided_slice %39 {offsets = [0, 96], sizes = [2, 32], strides = [1, 1]} : vector<2x128xf32> to vector<2x32xf32>
    %cst_18 = arith.constant 2.000000e+00 : f32
    %44 = vector.broadcast %cst_18 : f32 to vector<2x32xf32>
    %45 = arith.mulf %44, %43 : vector<2x32xf32>
    %cst_19 = arith.constant 1.000000e+00 : f32
    %46 = vector.broadcast %cst_19 : f32 to vector<2x32xf32>
    %47 = arith.subf %45, %46 : vector<2x32xf32>
    %48 = arith.mulf %41, %26 : vector<2x32xf32>
    %49 = arith.mulf %40, %47 : vector<2x32xf32>
    %50 = arith.addf %48, %49 : vector<2x32xf32>
    %51 = math.tanh %50 : vector<2x32xf32>
    %52 = arith.mulf %42, %51 : vector<2x32xf32>
    %c0_20 = arith.constant 0 : index
    %c32 = arith.constant 32 : index
    %53 = vector.load %arg5[%c0_20, %c32] : memref<2x256xf32, #tpu.memory_space<vmem>>, vector<2x32xf32>
    tpu.vector_store %arg5[%c0_20, %c32], %52 {strides = array<i32>} : memref<2x256xf32, #tpu.memory_space<vmem>>, vector<2x32xf32>,
    %c0_21 = arith.constant 0 : index
    %c2 = arith.constant 2 : index
    %c0_22 = arith.constant 0 : index
    %54 = vector.load %arg1[%c0_21, %c2, %c0_22] : memref<2x8x128xf32, #tpu.memory_space<vmem>>, vector<2x1x128xf32>
    %55 = vector.shape_cast %54 : vector<2x1x128xf32> to vector<2x128xf32>
    %56 = arith.truncf %52 : vector<2x32xf32> to vector<2x32xbf16>
    %cst_23 = arith.constant dense<0.000000e+00> : vector<2x128xf32>
    %57 = tpu.matmul %56, %3, %cst_23 {dimension_numbers = #tpu.dot_dimension_numbers<[1], [0], [0], [1], [0, 0, 1, 1], [], []>} : vector<2x32xbf16>, vector<32x128xbf16>, vector<2x128xf32> -> vector<2x128xf32>
    %58 = arith.addf %55, %57 : vector<2x128xf32>
    %59 = arith.negf %58 : vector<2x128xf32>
    %60 = math.exp %59 : vector<2x128xf32>
    %cst_24 = arith.constant 1.000000e+00 : f32
    %61 = vector.broadcast %cst_24 : f32 to vector<2x128xf32>
    %62 = arith.addf %61, %60 : vector<2x128xf32>
    %63 = arith.divf %61, %62 : vector<2x128xf32>
    %64 = vector.extract_strided_slice %63 {offsets = [0, 0], sizes = [2, 32], strides = [1, 1]} : vector<2x128xf32> to vector<2x32xf32>
    %65 = vector.extract_strided_slice %63 {offsets = [0, 32], sizes = [2, 32], strides = [1, 1]} : vector<2x128xf32> to vector<2x32xf32>
    %66 = vector.extract_strided_slice %63 {offsets = [0, 64], sizes = [2, 32], strides = [1, 1]} : vector<2x128xf32> to vector<2x32xf32>
    %67 = vector.extract_strided_slice %63 {offsets = [0, 96], sizes = [2, 32], strides = [1, 1]} : vector<2x128xf32> to vector<2x32xf32>
    %cst_25 = arith.constant 2.000000e+00 : f32
    %68 = vector.broadcast %cst_25 : f32 to vector<2x32xf32>
    %69 = arith.mulf %68, %67 : vector<2x32xf32>
    %cst_26 = arith.constant 1.000000e+00 : f32
    %70 = vector.broadcast %cst_26 : f32 to vector<2x32xf32>
    %71 = arith.subf %69, %70 : vector<2x32xf32>
    %72 = arith.mulf %65, %50 : vector<2x32xf32>
    %73 = arith.mulf %64, %71 : vector<2x32xf32>
    %74 = arith.addf %72, %73 : vector<2x32xf32>
    %75 = math.tanh %74 : vector<2x32xf32>
    %76 = arith.mulf %66, %75 : vector<2x32xf32>
    %c0_27 = arith.constant 0 : index
    %c64 = arith.constant 64 : index
    %77 = vector.load %arg5[%c0_27, %c64] : memref<2x256xf32, #tpu.memory_space<vmem>>, vector<2x32xf32>
    tpu.vector_store %arg5[%c0_27, %c64], %76 {strides = array<i32>} : memref<2x256xf32, #tpu.memory_space<vmem>>, vector<2x32xf32>,
    %c0_28 = arith.constant 0 : index
    %c3 = arith.constant 3 : index
    %c0_29 = arith.constant 0 : index
    %78 = vector.load %arg1[%c0_28, %c3, %c0_29] : memref<2x8x128xf32, #tpu.memory_space<vmem>>, vector<2x1x128xf32>
    %79 = vector.shape_cast %78 : vector<2x1x128xf32> to vector<2x128xf32>
    %80 = arith.truncf %76 : vector<2x32xf32> to vector<2x32xbf16>
    %cst_30 = arith.constant dense<0.000000e+00> : vector<2x128xf32>
    %81 = tpu.matmul %80, %3, %cst_30 {dimension_numbers = #tpu.dot_dimension_numbers<[1], [0], [0], [1], [0, 0, 1, 1], [], []>} : vector<2x32xbf16>, vector<32x128xbf16>, vector<2x128xf32> -> vector<2x128xf32>
    %82 = arith.addf %79, %81 : vector<2x128xf32>
    %83 = arith.negf %82 : vector<2x128xf32>
    %84 = math.exp %83 : vector<2x128xf32>
    %cst_31 = arith.constant 1.000000e+00 : f32
    %85 = vector.broadcast %cst_31 : f32 to vector<2x128xf32>
    %86 = arith.addf %85, %84 : vector<2x128xf32>
    %87 = arith.divf %85, %86 : vector<2x128xf32>
    %88 = vector.extract_strided_slice %87 {offsets = [0, 0], sizes = [2, 32], strides = [1, 1]} : vector<2x128xf32> to vector<2x32xf32>
    %89 = vector.extract_strided_slice %87 {offsets = [0, 32], sizes = [2, 32], strides = [1, 1]} : vector<2x128xf32> to vector<2x32xf32>
    %90 = vector.extract_strided_slice %87 {offsets = [0, 64], sizes = [2, 32], strides = [1, 1]} : vector<2x128xf32> to vector<2x32xf32>
    %91 = vector.extract_strided_slice %87 {offsets = [0, 96], sizes = [2, 32], strides = [1, 1]} : vector<2x128xf32> to vector<2x32xf32>
    %cst_32 = arith.constant 2.000000e+00 : f32
    %92 = vector.broadcast %cst_32 : f32 to vector<2x32xf32>
    %93 = arith.mulf %92, %91 : vector<2x32xf32>
    %cst_33 = arith.constant 1.000000e+00 : f32
    %94 = vector.broadcast %cst_33 : f32 to vector<2x32xf32>
    %95 = arith.subf %93, %94 : vector<2x32xf32>
    %96 = arith.mulf %89, %74 : vector<2x32xf32>
    %97 = arith.mulf %88, %95 : vector<2x32xf32>
    %98 = arith.addf %96, %97 : vector<2x32xf32>
    %99 = math.tanh %98 : vector<2x32xf32>
    %100 = arith.mulf %90, %99 : vector<2x32xf32>
    %c0_34 = arith.constant 0 : index
    %c96 = arith.constant 96 : index
    %101 = vector.load %arg5[%c0_34, %c96] : memref<2x256xf32, #tpu.memory_space<vmem>>, vector<2x32xf32>
    tpu.vector_store %arg5[%c0_34, %c96], %100 {strides = array<i32>} : memref<2x256xf32, #tpu.memory_space<vmem>>, vector<2x32xf32>,
    %c0_35 = arith.constant 0 : index
    %c4 = arith.constant 4 : index
    %c0_36 = arith.constant 0 : index
    %102 = vector.load %arg1[%c0_35, %c4, %c0_36] : memref<2x8x128xf32, #tpu.memory_space<vmem>>, vector<2x1x128xf32>
    %103 = vector.shape_cast %102 : vector<2x1x128xf32> to vector<2x128xf32>
    %104 = arith.truncf %100 : vector<2x32xf32> to vector<2x32xbf16>
    %cst_37 = arith.constant dense<0.000000e+00> : vector<2x128xf32>
    %105 = tpu.matmul %104, %3, %cst_37 {dimension_numbers = #tpu.dot_dimension_numbers<[1], [0], [0], [1], [0, 0, 1, 1], [], []>} : vector<2x32xbf16>, vector<32x128xbf16>, vector<2x128xf32> -> vector<2x128xf32>
    %106 = arith.addf %103, %105 : vector<2x128xf32>
    %107 = arith.negf %106 : vector<2x128xf32>
    %108 = math.exp %107 : vector<2x128xf32>
    %cst_38 = arith.constant 1.000000e+00 : f32
    %109 = vector.broadcast %cst_38 : f32 to vector<2x128xf32>
    %110 = arith.addf %109, %108 : vector<2x128xf32>
    %111 = arith.divf %109, %110 : vector<2x128xf32>
    %112 = vector.extract_strided_slice %111 {offsets = [0, 0], sizes = [2, 32], strides = [1, 1]} : vector<2x128xf32> to vector<2x32xf32>
    %113 = vector.extract_strided_slice %111 {offsets = [0, 32], sizes = [2, 32], strides = [1, 1]} : vector<2x128xf32> to vector<2x32xf32>
    %114 = vector.extract_strided_slice %111 {offsets = [0, 64], sizes = [2, 32], strides = [1, 1]} : vector<2x128xf32> to vector<2x32xf32>
    %115 = vector.extract_strided_slice %111 {offsets = [0, 96], sizes = [2, 32], strides = [1, 1]} : vector<2x128xf32> to vector<2x32xf32>
    %cst_39 = arith.constant 2.000000e+00 : f32
    %116 = vector.broadcast %cst_39 : f32 to vector<2x32xf32>
    %117 = arith.mulf %116, %115 : vector<2x32xf32>
    %cst_40 = arith.constant 1.000000e+00 : f32
    %118 = vector.broadcast %cst_40 : f32 to vector<2x32xf32>
    %119 = arith.subf %117, %118 : vector<2x32xf32>
    %120 = arith.mulf %113, %98 : vector<2x32xf32>
    %121 = arith.mulf %112, %119 : vector<2x32xf32>
    %122 = arith.addf %120, %121 : vector<2x32xf32>
    %123 = math.tanh %122 : vector<2x32xf32>
    %124 = arith.mulf %114, %123 : vector<2x32xf32>
    %c0_41 = arith.constant 0 : index
    %c128 = arith.constant 128 : index
    %125 = vector.load %arg5[%c0_41, %c128] : memref<2x256xf32, #tpu.memory_space<vmem>>, vector<2x32xf32>
    tpu.vector_store %arg5[%c0_41, %c128], %124 {strides = array<i32>} : memref<2x256xf32, #tpu.memory_space<vmem>>, vector<2x32xf32>,
    %c0_42 = arith.constant 0 : index
    %c5 = arith.constant 5 : index
    %c0_43 = arith.constant 0 : index
    %126 = vector.load %arg1[%c0_42, %c5, %c0_43] : memref<2x8x128xf32, #tpu.memory_space<vmem>>, vector<2x1x128xf32>
    %127 = vector.shape_cast %126 : vector<2x1x128xf32> to vector<2x128xf32>
    %128 = arith.truncf %124 : vector<2x32xf32> to vector<2x32xbf16>
    %cst_44 = arith.constant dense<0.000000e+00> : vector<2x128xf32>
    %129 = tpu.matmul %128, %3, %cst_44 {dimension_numbers = #tpu.dot_dimension_numbers<[1], [0], [0], [1], [0, 0, 1, 1], [], []>} : vector<2x32xbf16>, vector<32x128xbf16>, vector<2x128xf32> -> vector<2x128xf32>
    %130 = arith.addf %127, %129 : vector<2x128xf32>
    %131 = arith.negf %130 : vector<2x128xf32>
    %132 = math.exp %131 : vector<2x128xf32>
    %cst_45 = arith.constant 1.000000e+00 : f32
    %133 = vector.broadcast %cst_45 : f32 to vector<2x128xf32>
    %134 = arith.addf %133, %132 : vector<2x128xf32>
    %135 = arith.divf %133, %134 : vector<2x128xf32>
    %136 = vector.extract_strided_slice %135 {offsets = [0, 0], sizes = [2, 32], strides = [1, 1]} : vector<2x128xf32> to vector<2x32xf32>
    %137 = vector.extract_strided_slice %135 {offsets = [0, 32], sizes = [2, 32], strides = [1, 1]} : vector<2x128xf32> to vector<2x32xf32>
    %138 = vector.extract_strided_slice %135 {offsets = [0, 64], sizes = [2, 32], strides = [1, 1]} : vector<2x128xf32> to vector<2x32xf32>
    %139 = vector.extract_strided_slice %135 {offsets = [0, 96], sizes = [2, 32], strides = [1, 1]} : vector<2x128xf32> to vector<2x32xf32>
    %cst_46 = arith.constant 2.000000e+00 : f32
    %140 = vector.broadcast %cst_46 : f32 to vector<2x32xf32>
    %141 = arith.mulf %140, %139 : vector<2x32xf32>
    %cst_47 = arith.constant 1.000000e+00 : f32
    %142 = vector.broadcast %cst_47 : f32 to vector<2x32xf32>
    %143 = arith.subf %141, %142 : vector<2x32xf32>
    %144 = arith.mulf %137, %122 : vector<2x32xf32>
    %145 = arith.mulf %136, %143 : vector<2x32xf32>
    %146 = arith.addf %144, %145 : vector<2x32xf32>
    %147 = math.tanh %146 : vector<2x32xf32>
    %148 = arith.mulf %138, %147 : vector<2x32xf32>
    %c0_48 = arith.constant 0 : index
    %c160 = arith.constant 160 : index
    %149 = vector.load %arg5[%c0_48, %c160] : memref<2x256xf32, #tpu.memory_space<vmem>>, vector<2x32xf32>
    tpu.vector_store %arg5[%c0_48, %c160], %148 {strides = array<i32>} : memref<2x256xf32, #tpu.memory_space<vmem>>, vector<2x32xf32>,
    %c0_49 = arith.constant 0 : index
    %c6 = arith.constant 6 : index
    %c0_50 = arith.constant 0 : index
    %150 = vector.load %arg1[%c0_49, %c6, %c0_50] : memref<2x8x128xf32, #tpu.memory_space<vmem>>, vector<2x1x128xf32>
    %151 = vector.shape_cast %150 : vector<2x1x128xf32> to vector<2x128xf32>
    %152 = arith.truncf %148 : vector<2x32xf32> to vector<2x32xbf16>
    %cst_51 = arith.constant dense<0.000000e+00> : vector<2x128xf32>
    %153 = tpu.matmul %152, %3, %cst_51 {dimension_numbers = #tpu.dot_dimension_numbers<[1], [0], [0], [1], [0, 0, 1, 1], [], []>} : vector<2x32xbf16>, vector<32x128xbf16>, vector<2x128xf32> -> vector<2x128xf32>
    %154 = arith.addf %151, %153 : vector<2x128xf32>
    %155 = arith.negf %154 : vector<2x128xf32>
    %156 = math.exp %155 : vector<2x128xf32>
    %cst_52 = arith.constant 1.000000e+00 : f32
    %157 = vector.broadcast %cst_52 : f32 to vector<2x128xf32>
    %158 = arith.addf %157, %156 : vector<2x128xf32>
    %159 = arith.divf %157, %158 : vector<2x128xf32>
    %160 = vector.extract_strided_slice %159 {offsets = [0, 0], sizes = [2, 32], strides = [1, 1]} : vector<2x128xf32> to vector<2x32xf32>
    %161 = vector.extract_strided_slice %159 {offsets = [0, 32], sizes = [2, 32], strides = [1, 1]} : vector<2x128xf32> to vector<2x32xf32>
    %162 = vector.extract_strided_slice %159 {offsets = [0, 64], sizes = [2, 32], strides = [1, 1]} : vector<2x128xf32> to vector<2x32xf32>
    %163 = vector.extract_strided_slice %159 {offsets = [0, 96], sizes = [2, 32], strides = [1, 1]} : vector<2x128xf32> to vector<2x32xf32>
    %cst_53 = arith.constant 2.000000e+00 : f32
    %164 = vector.broadcast %cst_53 : f32 to vector<2x32xf32>
    %165 = arith.mulf %164, %163 : vector<2x32xf32>
    %cst_54 = arith.constant 1.000000e+00 : f32
    %166 = vector.broadcast %cst_54 : f32 to vector<2x32xf32>
    %167 = arith.subf %165, %166 : vector<2x32xf32>
    %168 = arith.mulf %161, %146 : vector<2x32xf32>
    %169 = arith.mulf %160, %167 : vector<2x32xf32>
    %170 = arith.addf %168, %169 : vector<2x32xf32>
    %171 = math.tanh %170 : vector<2x32xf32>
    %172 = arith.mulf %162, %171 : vector<2x32xf32>
    %c0_55 = arith.constant 0 : index
    %c192 = arith.constant 192 : index
    %173 = vector.load %arg5[%c0_55, %c192] : memref<2x256xf32, #tpu.memory_space<vmem>>, vector<2x32xf32>
    tpu.vector_store %arg5[%c0_55, %c192], %172 {strides = array<i32>} : memref<2x256xf32, #tpu.memory_space<vmem>>, vector<2x32xf32>,
    %c0_56 = arith.constant 0 : index
    %c7 = arith.constant 7 : index
    %c0_57 = arith.constant 0 : index
    %174 = vector.load %arg1[%c0_56, %c7, %c0_57] : memref<2x8x128xf32, #tpu.memory_space<vmem>>, vector<2x1x128xf32>
    %175 = vector.shape_cast %174 : vector<2x1x128xf32> to vector<2x128xf32>
    %176 = arith.truncf %172 : vector<2x32xf32> to vector<2x32xbf16>
    %cst_58 = arith.constant dense<0.000000e+00> : vector<2x128xf32>
    %177 = tpu.matmul %176, %3, %cst_58 {dimension_numbers = #tpu.dot_dimension_numbers<[1], [0], [0], [1], [0, 0, 1, 1], [], []>} : vector<2x32xbf16>, vector<32x128xbf16>, vector<2x128xf32> -> vector<2x128xf32>
    %178 = arith.addf %175, %177 : vector<2x128xf32>
    %179 = arith.negf %178 : vector<2x128xf32>
    %180 = math.exp %179 : vector<2x128xf32>
    %cst_59 = arith.constant 1.000000e+00 : f32
    %181 = vector.broadcast %cst_59 : f32 to vector<2x128xf32>
    %182 = arith.addf %181, %180 : vector<2x128xf32>
    %183 = arith.divf %181, %182 : vector<2x128xf32>
    %184 = vector.extract_strided_slice %183 {offsets = [0, 0], sizes = [2, 32], strides = [1, 1]} : vector<2x128xf32> to vector<2x32xf32>
    %185 = vector.extract_strided_slice %183 {offsets = [0, 32], sizes = [2, 32], strides = [1, 1]} : vector<2x128xf32> to vector<2x32xf32>
    %186 = vector.extract_strided_slice %183 {offsets = [0, 64], sizes = [2, 32], strides = [1, 1]} : vector<2x128xf32> to vector<2x32xf32>
    %187 = vector.extract_strided_slice %183 {offsets = [0, 96], sizes = [2, 32], strides = [1, 1]} : vector<2x128xf32> to vector<2x32xf32>
    %cst_60 = arith.constant 2.000000e+00 : f32
    %188 = vector.broadcast %cst_60 : f32 to vector<2x32xf32>
    %189 = arith.mulf %188, %187 : vector<2x32xf32>
    %cst_61 = arith.constant 1.000000e+00 : f32
    %190 = vector.broadcast %cst_61 : f32 to vector<2x32xf32>
    %191 = arith.subf %189, %190 : vector<2x32xf32>
    %192 = arith.mulf %185, %170 : vector<2x32xf32>
    %193 = arith.mulf %184, %191 : vector<2x32xf32>
    %194 = arith.addf %192, %193 : vector<2x32xf32>
    %195 = math.tanh %194 : vector<2x32xf32>
    %196 = arith.mulf %186, %195 : vector<2x32xf32>
    %c0_62 = arith.constant 0 : index
    %c224 = arith.constant 224 : index
    %197 = vector.load %arg5[%c0_62, %c224] : memref<2x256xf32, #tpu.memory_space<vmem>>, vector<2x32xf32>
    tpu.vector_store %arg5[%c0_62, %c224], %196 {strides = array<i32>} : memref<2x256xf32, #tpu.memory_space<vmem>>, vector<2x32xf32>,
    %c0_63 = arith.constant 0 : index
    %c0_64 = arith.constant 0 : index
    %198 = vector.load %arg8[%c0_63, %c0_64] : memref<2x32xf32, #tpu.memory_space<vmem>>, vector<2x32xf32>
    tpu.vector_store %arg8[%c0_63, %c0_64], %196 {strides = array<i32>} : memref<2x32xf32, #tpu.memory_space<vmem>>, vector<2x32xf32>,
    %c0_65 = arith.constant 0 : index
    %c0_66 = arith.constant 0 : index
    %199 = vector.load %arg9[%c0_65, %c0_66] : memref<2x32xf32, #tpu.memory_space<vmem>>, vector<2x32xf32>
    tpu.vector_store %arg9[%c0_65, %c0_66], %194 {strides = array<i32>} : memref<2x32xf32, #tpu.memory_space<vmem>>, vector<2x32xf32>,
    %c0_i32_67 = arith.constant 0 : i32
    %200 = arith.cmpi eq, %arg0, %c0_i32_67 : i32
    %201 = arith.extui %200 : i1 to i32
    %c0_i32_68 = arith.constant 0 : i32
    %202 = arith.cmpi ne, %201, %c0_i32_68 : i32
    scf.if %202 {
      %c0_69 = arith.constant 0 : index
      %c0_70 = arith.constant 0 : index
      %203 = vector.load %arg6[%c0_69, %c0_70] : memref<2x32xf32, #tpu.memory_space<vmem>>, vector<2x32xf32>
      tpu.vector_store %arg6[%c0_69, %c0_70], %196 {strides = array<i32>} : memref<2x32xf32, #tpu.memory_space<vmem>>, vector<2x32xf32>,
      %c0_71 = arith.constant 0 : index
      %c0_72 = arith.constant 0 : index
      %204 = vector.load %arg7[%c0_71, %c0_72] : memref<2x32xf32, #tpu.memory_space<vmem>>, vector<2x32xf32>
      tpu.vector_store %arg7[%c0_71, %c0_72], %194 {strides = array<i32>} : memref<2x32xf32, #tpu.memory_space<vmem>>, vector<2x32xf32>,
    } else {
    }
    return
  }
  func.func @transform_0(%arg0: i32) -> (i32, i32, i32) {
    %c0_i32 = arith.constant 0 : i32
    %c0_i32_0 = arith.constant 0 : i32
    %c0_i32_1 = arith.constant 0 : i32
    return %c0_i32, %arg0, %c0_i32_0 : i32, i32, i32
  }
  func.func @transform_1(%arg0: i32) -> (i32, i32) {
    %c0_i32 = arith.constant 0 : i32
    %c0_i32_0 = arith.constant 0 : i32
    %c0_i32_1 = arith.constant 0 : i32
    return %c0_i32, %c0_i32_0 : i32, i32
  }
  func.func @transform_2(%arg0: i32) -> (i32, i32) {
    %c0_i32 = arith.constant 0 : i32
    %c0_i32_0 = arith.constant 0 : i32
    %c0_i32_1 = arith.constant 0 : i32
    return %c0_i32, %c0_i32_0 : i32, i32
  }
  func.func @transform_3(%arg0: i32) -> (i32, i32) {
    %c0_i32 = arith.constant 0 : i32
    %c0_i32_0 = arith.constant 0 : i32
    %c0_i32_1 = arith.constant 0 : i32
    return %c0_i32, %c0_i32_0 : i32, i32
  }
  func.func @transform_4(%arg0: i32) -> (i32, i32) {
    %c0_i32 = arith.constant 0 : i32
    %c0_i32_0 = arith.constant 0 : i32
    return %c0_i32, %arg0 : i32, i32
  }
  func.func @transform_5(%arg0: i32) -> (i32, i32) {
    %c0_i32 = arith.constant 0 : i32
    %c0_i32_0 = arith.constant 0 : i32
    %c0_i32_1 = arith.constant 0 : i32
    return %c0_i32, %c0_i32_0 : i32, i32
  }
  func.func @transform_6(%arg0: i32) -> (i32, i32) {
    %c0_i32 = arith.constant 0 : i32
    %c0_i32_0 = arith.constant 0 : i32
    %c0_i32_1 = arith.constant 0 : i32
    return %c0_i32, %c0_i32_0 : i32, i32
  }
}

</mosaic_0001>

<bundles_post_ra>
// kernel: tpu_custom_call.1
= control target key start
LH: loop header
LB: loop body
LE: loop exit
PB: predicated region body
PF: predicated region fallthrough
CT: control target
= control target key end

     0   :  { %12 = vsyncpa [#allocation5], 0  ;;  %s1739_s0 = inlined_call_operand.hbm [shape: f32[2,8,128], index: 0, kind: input, shape index: {}]   ;;  %s1740_s1 = inlined_call_operand.hbm [shape: bf16[32,128], index: 1, kind: input, shape index: {}]   ;;  %s1741_s2 = inlined_call_operand.hbm [shape: f32[2,32], index: 2, kind: input, shape index: {}]   ;;  %s1742_s3 = inlined_call_operand.vmem [shape: f32[2,32], index: 3, kind: input, shape index: {}]   ;;  %s1743_s4 = inlined_call_operand.hbm [shape: f32[2,256], index: 4, kind: output, shape index: {0}]   ;;  %s1744_s5 = inlined_call_operand.hbm [shape: f32[2,32], index: 5, kind: output, shape index: {1}]   ;;  %s1745_s6 = inlined_call_operand.hbm [shape: f32[2,32], index: 6, kind: output, shape index: {2}]  }
   0x1   :  { %13 = vsyncpa [#allocation8], 0 }
   0x2   :  { %14 = vsyncpa [#allocation6], 0  ;;  %s33_s23 = sshll.u32 %s1740_s1, 4  ;;  %s34_s23 = int_to_ptr.hbm [resolvable:$true] %s33_s23 }
   0x3   :  { %15 = vsyncpa [#allocation12], 0  ;;  %s1469_s24 = smov [#allocation7]   ;;  %s20_s28 = sshll.u32 %s1739_s0, 4  ;;  %s21_s28 = int_to_ptr.hbm [resolvable:$true] %s20_s28 }
   0x4   :  { %s35_s25 = sshll.u32 %s1469_s24, 4  ;;  %s1470_s29 = smov 64   ;;  %s36_s25 = int_to_ptr.vmem [resolvable:$true] %s35_s25 }
   0x5   :  { %s1471_s30 = smov 4   ;;  %s1472_s7 = smov [#allocation4]  }
   0x6   :  { %41 = dma.hbm_to_vmem [thread:$0]  %s34_s23, 256, %s36_s25, [#allocation8], %s1470_s29, %s1470_s29, %s1471_s30  }
   0x7   :  { %s22_s8 = sshll.u32 %s1472_s7, 4  ;;  %s1473_s9 = smov 128   ;;  %s23_s8 = int_to_ptr.vmem [resolvable:$true] %s22_s8 }
   0x8   :  { %s1474_s1 = smov 8   ;;  %s47_s12 = sshll.u32 %s1741_s2, 4  ;;  %s48_s12 = int_to_ptr.hbm [resolvable:$true] %s47_s12 }
   0x9   :  { %28 = dma.hbm_to_vmem [thread:$0]  %s21_s28, 256, %s23_s8, [#allocation5], %s1473_s9, %s1473_s9, %s1474_s1  }
   0xa   :  { %s1475_s13 = smov [#allocation9]  }
   0xb   :  { %s49_s14 = sshll.u32 %s1475_s13, 4  ;;  %s50_s14 = int_to_ptr.vmem [resolvable:$true] %s49_s14 }
   0xc   :  { %52 = dma.hbm_to_vmem [thread:$0]  %s48_s12, 32, %s50_s14, [#allocation8]  }
   0xd   :  { %1461 = dma.done.wait [#allocation5], 256  }
   0xe   :  { %1462 = vsyncadd [#allocation5], 4294967040 }
   0xf   :  { %1463 = dma.done.wait [#allocation8], 288  }
  0x10   :  { %1464 = vsyncadd [#allocation8], 4294967008  ;;  %vm73_vm0 = vcmask 254976   ;;  %v1208_v0 = vld [vmem:[#allocation7 + $0x8] sm:$0xff]  ;;  %v72_v1 = vld [vmem:[#allocation9] sm:$0x3] }
  0x11   :  { %74 = vst.msk [vmem:[#allocation2] sm:$0x3] %vm73_vm0, %v72_v1  ;;  %v75_v2 = vld [vmem:[%s1742_s3] sm:$0x3]  ;;  %108 = vmatpush.bf16.msra.mxu0 %v1208_v0  ;;  %v1207_v3 = vld [vmem:[#allocation7] sm:$0xff]  ;;  %247 = vmatpush.bf16.msra.mxu1 %v1208_v0  ;;  %vm98_vm1 = vcmask 261120  }
  0x12   :  { %76 = vst.msk [vmem:[#allocation3] sm:$0x3] %vm73_vm0, %v75_v2  ;;  %372 = vmatpush.bf16.msra.mxu2 %v1208_v0  ;;  %495 = vmatpush.bf16.msra.mxu3 %v1208_v0  ;;  %s1476_s2 = smov 32   ;;  %v83_v8 = vld [vmem:[#allocation4] sm:$0x1]  ;;  %vm212_vm10 = vcmask 1041409  }
  0x13   :  { %v84_v9 = vld [vmem:[#allocation4 + $0x8] sm:$0x1]  ;;  %vm214_vm11 = vcmask 1043459   ;;  %vm216_vm12 = vcmask 1045509   ;;  %vm218_vm13 = vcmask 1047559   ;;  %s1477_s3 = smov 96  }
  0x14   :  { %s1478_s16 = smov [#allocation11]   ;;  %s1128_s20 = sshll.u32 %s1744_s5, 4  ;;  %s1129_s20 = int_to_ptr.hbm [resolvable:$true] %s1128_s20 }
  0x15   :  { %109 = vmatpush.bf16.msra.mxu0 %v1207_v3  ;;  %248 = vmatpush.bf16.msra.mxu1 %v1207_v3  ;;  %s1126_s17 = sshll.u32 %s1478_s16, 4  ;;  %s1479_s21 = smov [#allocation10]   ;;  %s1127_s17 = int_to_ptr.vmem [resolvable:$true] %s1126_s17 }
  0x16   :  { %373 = vmatpush.bf16.msra.mxu2 %v1207_v3  ;;  %496 = vmatpush.bf16.msra.mxu3 %v1207_v3  ;;  %s1115_s22 = sshll.u32 %s1479_s21, 4  ;;  %s1117_s25 = sshll.u32 %s1743_s4, 4  ;;  %s1116_s22 = int_to_ptr.vmem [resolvable:$true] %s1115_s22  ;;  %s1118_s25 = int_to_ptr.hbm [resolvable:$true] %s1117_s25 }
  0x17   :  { %s1480_s5 = smov [#allocation13]  }
  0x18   :  { %v81_v4 = vld [vmem:[#allocation2] sm:$0x3]  ;;  %s1137_s26 = sshll.u32 %s1480_s5, 4  ;;  %s1138_s26 = int_to_ptr.vmem [resolvable:$true] %s1137_s26 }
  0x19   :  { %620 = vmatpush.bf16.msrb.mxu0 %v1208_v0  ;;  %744 = vmatpush.bf16.msrb.mxu1 %v1208_v0  ;;  %v85_v5 = vpack.c.bf16 %v81_v4, %v81_v4  ;;  %v82_v6 = vld [vmem:[#allocation3] sm:$0x3] }
  0x1a   :  { %868 = vmatpush.bf16.msrb.mxu2 %v1208_v0  ;;  %990 = vmatpush.bf16.msrb.mxu3 %v1208_v0  ;;  %v164_v7 = vrot.slane %v82_v6, 1 }
  0x1b   :  { %1167 = vmatmul.msk.bf16.vlgmr.msra.gmra.mxu0 %vm98_vm1, %v85_v5 }
  0x1c   :  { %167 = vrot.lane.b32.xlu1 %v164_v7, %s1476_s2 }
  0x1d   :  { %621 = vmatpush.bf16.msrb.mxu0 %v1207_v3  ;;  %745 = vmatpush.bf16.msrb.mxu1 %v1207_v3 }
  0x1e   :  { %869 = vmatpush.bf16.msrb.mxu2 %v1207_v3  ;;  %991 = vmatpush.bf16.msrb.mxu3 %v1207_v3 }
  0x24   :  { %165 = vrot.lane.b32.xlu1 %v82_v6, %s1476_s2 }
  0x8e   :  { %v168_v49 = vpop.permute.xlu1 %167 }
  0x96   :  { %v166_v53 = vpop.permute.xlu1 %165 }
  0x98   :  { %v111_v10 = vpop.f32.mrf.mxu0 }
  0x99   :  { %v116_v11 = vrot.slane %v111_v10, 1  ;;  %v119_v12 = vadd.f32 %v111_v10, %v83_v8 }
  0x9b   :  { %v120_v13 = vadd.f32 %v116_v11, %v84_v9  ;;  %v1168_v14 = vmul.f32 -1.442695, %v119_v12  ;;  %v225_v12 = vld [vmem:[#allocation4 + $0x1] sm:$0x1] }
  0x9d   :  { %1221 = vpow2.f32 %v1168_v14  ;;  %v1169_v15 = vmul.f32 -1.442695, %v120_v13  ;;  %v226_v13 = vld [vmem:[#allocation4 + $0x9] sm:$0x1] }
  0x9f   :  { %1223 = vpow2.f32 %v1169_v15 }
  0xa0   :  { %v113_v16 = vpop.f32.mrf.mxu0 }
  0xa3   :  { %v1222_v17 = vpop.eup %1221 }
  0xa4   :  { %v127_v18 = vadd.f32 1.0, %v1222_v17 }
  0xa5   :  { %v1224_v19 = vpop.eup %1223 }
  0xa6   :  { %v128_v20 = vadd.f32 1.0, %v1224_v19  ;;  %1225 = vrcp.f32 %v127_v18  ;;  %v140_v34 = vand.u32 2147483648, %v127_v18  ;;  %vm134_vm7 = vweird.f32 %v127_v18 }
  0xa7   :  { %v138_v36 = vand.u32 2147483647, %v127_v18 }
  0xa8   :  { %1227 = vrcp.f32 %v128_v20  ;;  %v155_v28 = vand.u32 2147483648, %v128_v20  ;;  %v153_v30 = vand.u32 2147483647, %v128_v20  ;;  %vm149_vm3 = vweird.f32 %v128_v20 }
  0xa9   :  { %v141_v40 = vor.u32 1.1754944e-38, %v140_v34  ;;  %vm139_vm9 = vcmp.eq.f32.partialorder %v138_v36, 8.507059e+37 }
  0xaa   :  { %v156_v33 = vor.u32 1.1754944e-38, %v155_v28  ;;  %vm154_vm6 = vcmp.eq.f32.partialorder %v153_v30, 8.507059e+37 }
  0xac   :  { %v1226_v21 = vpop.eup %1225 }
  0xad   :  { %v130_v22 = vmul.f32 %v1226_v21, %v127_v18  ;;  %vm135_vm4 = vweird.f32 %v1226_v21 }
  0xae   :  { %v1228_v23 = vpop.eup %1227  ;;  %vm136_vm8 = vmor %vm134_vm7, %vm135_vm4 }
  0xaf   :  { %v145_v24 = vmul.f32 %v1228_v23, %v128_v20  ;;  %v131_v25 = vsub.f32 1.0, %v130_v22  ;;  %vm150_vm2 = vweird.f32 %v1228_v23 }
  0xb0   :  { %vm151_vm5 = vmor %vm149_vm3, %vm150_vm2 }
  0xb1   :  { %v146_v26 = vsub.f32 1.0, %v145_v24  ;;  %v132_v27 = vmul.f32 %v1226_v21, %v131_v25 }
  0xb3   :  { %v147_v29 = vmul.f32 %v1228_v23, %v146_v26  ;;  %v133_v32 = vadd.f32 %v1226_v21, %v132_v27 }
  0xb5   :  { %v148_v31 = vadd.f32 %v1228_v23, %v147_v29  ;;  %v137_v38 = vsel %vm136_vm8, %v1226_v21, %v133_v32 }
  0xb6   :  { %v142_v42 = vsel %vm139_vm9, %v141_v40, %v137_v38 }
  0xb7   :  { %v152_v35 = vsel %vm151_vm5, %v1228_v23, %v148_v31  ;;  %v159_v43 = vmul.f32 2.0, %v142_v42  ;;  %v171_v54 = vmul.f32 %v166_v53, %v142_v42 }
  0xb8   :  { %v157_v37 = vsel %vm154_vm6, %v156_v33, %v152_v35 }
  0xb9   :  { %v160_v39 = vmul.f32 2.0, %v157_v37  ;;  %v1170_v44 = vadd.f32 -1.0, %v159_v43  ;;  %v172_v50 = vmul.f32 %v168_v49, %v157_v37 }
  0xbb   :  { %v1171_v41 = vadd.f32 -1.0, %v160_v39 }
  0xbd   :  { %177 = vrot.lane.b32.xlu0 %v1171_v41, %s1476_s2 }
  0xc5   :  { %175 = vrot.lane.b32.xlu0 %v1170_v44, %s1476_s2 }
 0x12f   :  { %v178_v45 = vpop.permute.xlu0 %177 }
 0x130   :  { %v182_v46 = vmul.f32 %v178_v45, %v157_v37 }
 0x132   :  { %187 = vrot.lane.b32.xlu2 %v182_v46, %s1476_s2 }
 0x137   :  { %v176_v47 = vpop.permute.xlu0 %175 }
 0x138   :  { %v181_v48 = vmul.f32 %v176_v47, %v142_v42 }
 0x13a   :  { %185 = vrot.lane.b32.xlu2 %v181_v48, %s1476_s2 }
 0x18c   :  { %v188_v51 = vpop.permute.xlu2 %187 }
 0x18d   :  { %v1539_v52 = vadd.f32 %v188_v51, %v172_v50 }
 0x18f   :  { %1229 = vtanh.f32 %v1539_v52 }
 0x194   :  { %v186_v55 = vpop.permute.xlu2 %185 }
 0x195   :  { %v1230_v56 = vpop.eup %1229  ;;  %v1542_v57 = vadd.f32 %v186_v55, %v171_v54 }
 0x196   :  { %199 = vrot.lane.b32.xlu0 %v1230_v56, %s1476_s2 }
 0x197   :  { %1231 = vtanh.f32 %v1542_v57 }
 0x19d   :  { %v1232_v58 = vpop.eup %1231 }
 0x19e   :  { %197 = vrot.lane.b32.xlu1 %v1232_v58, %s1476_s2 }
 0x208   :  { %v200_v59 = vpop.permute.xlu0 %199 }
 0x209   :  { %v204_v60 = vmul.f32 %v200_v59, %v157_v37 }
 0x20b   :  { %v228_v61 = vpack.c.bf16 %v204_v60, %v204_v60  ;;  %v211_v63 = vrot.slane %v204_v60, 7 }
 0x20d   :  { %v232_v0 = vunpack.c.l.b16 %v228_v61 }
 0x20f   :  { %v233_v5 = vrot.slane %v232_v0, 7 }
 0x210   :  { %v198_v62 = vpop.permute.xlu1 %197 }
 0x211   :  { %v203_v1 = vmul.f32 %v198_v62, %v142_v42 }
 0x213   :  { %v213_v2 = vsel %vm212_vm10, %v211_v63, %v203_v1  ;;  %v227_v3 = vpack.c.bf16 %v203_v1, %v203_v1 }
 0x214   :  { %v215_v4 = vsel %vm214_vm11, %v211_v63, %v213_v2 }
 0x215   :  { %v231_v6 = vunpack.c.l.b16 %v227_v3  ;;  %v217_v7 = vsel %vm216_vm12, %v211_v63, %v215_v4 }
 0x216   :  { %v1551_v8 = vsel %vm218_vm13, %v211_v63, %v217_v7 }
 0x217   :  { %v234_v9 = vsel %vm212_vm10, %v233_v5, %v231_v6 }
 0x218   :  { %v235_v10 = vpack.c.b16 %v234_v9, %v234_v9 }
 0x21a   :  { %236 = vrot.lane.b32.xlu2 %v235_v10, %s1470_s29 }
 0x274   :  { %v237_v11 = vpop.permute.xlu2 %236 }
 0x275   :  { %1172 = vmatmul.msk.bf16.vlgmr.msra.gmra.mxu1 %vm98_vm1, %v237_v11 }
 0x2f2   :  { %v250_v14 = vpop.f32.mrf.mxu1 }
 0x2f3   :  { %v255_v15 = vrot.slane %v250_v14, 1  ;;  %v258_v16 = vadd.f32 %v250_v14, %v225_v12 }
 0x2f5   :  { %v259_v17 = vadd.f32 %v255_v15, %v226_v13  ;;  %v1173_v18 = vmul.f32 -1.442695, %v258_v16  ;;  %v350_v15 = vld [vmem:[#allocation4 + $0x2] sm:$0x1]  ;;  %v351_v16 = vld [vmem:[#allocation4 + $0xa] sm:$0x1] }
 0x2f7   :  { %1233 = vpow2.f32 %v1173_v18  ;;  %v1174_v19 = vmul.f32 -1.442695, %v259_v17 }
 0x2f9   :  { %1235 = vpow2.f32 %v1174_v19 }
 0x2fa   :  { %v252_v20 = vpop.f32.mrf.mxu1 }
 0x2fd   :  { %v1234_v21 = vpop.eup %1233 }
 0x2fe   :  { %v266_v22 = vadd.f32 1.0, %v1234_v21 }
 0x2ff   :  { %v1236_v23 = vpop.eup %1235 }
 0x300   :  { %v267_v24 = vadd.f32 1.0, %v1236_v23  ;;  %1237 = vrcp.f32 %v266_v22  ;;  %v279_v30 = vand.u32 2147483648, %v266_v22  ;;  %v277_v32 = vand.u32 2147483647, %v266_v22 }
 0x301   :  { %vm273_vm15 = vweird.f32 %v266_v22 }
 0x302   :  { %1239 = vrcp.f32 %v267_v24  ;;  %v294_v34 = vand.u32 2147483648, %v267_v24  ;;  %v292_v37 = vand.u32 2147483647, %v267_v24  ;;  %v280_v38 = vor.u32 1.1754944e-38, %v279_v30 }
 0x303   :  { %vm278_vm4 = vcmp.eq.f32.partialorder %v277_v32, 8.507059e+37  ;;  %vm288_vm5 = vweird.f32 %v267_v24 }
 0x304   :  { %v295_v42 = vor.u32 1.1754944e-38, %v294_v34  ;;  %vm293_vm7 = vcmp.eq.f32.partialorder %v292_v37, 8.507059e+37 }
 0x306   :  { %v1238_v25 = vpop.eup %1237 }
 0x307   :  { %v269_v26 = vmul.f32 %v1238_v25, %v266_v22  ;;  %vm274_vm14 = vweird.f32 %v1238_v25 }
 0x308   :  { %v1240_v27 = vpop.eup %1239  ;;  %vm275_vm3 = vmor %vm273_vm15, %vm274_vm14 }
 0x309   :  { %v270_v28 = vsub.f32 1.0, %v269_v26  ;;  %v284_v29 = vmul.f32 %v1240_v27, %v267_v24  ;;  %vm289_vm2 = vweird.f32 %v1240_v27 }
 0x30a   :  { %vm290_vm6 = vmor %vm288_vm5, %vm289_vm2 }
 0x30b   :  { %v271_v31 = vmul.f32 %v1238_v25, %v270_v28  ;;  %v285_v33 = vsub.f32 1.0, %v284_v29 }
 0x30d   :  { %v272_v35 = vadd.f32 %v1238_v25, %v271_v31  ;;  %v286_v36 = vmul.f32 %v1240_v27, %v285_v33 }
 0x30f   :  { %v276_v39 = vsel %vm275_vm3, %v1238_v25, %v272_v35  ;;  %v287_v40 = vadd.f32 %v1240_v27, %v286_v36 }
 0x310   :  { %v281_v41 = vsel %vm278_vm4, %v280_v38, %v276_v39 }
 0x311   :  { %v298_v43 = vmul.f32 2.0, %v281_v41  ;;  %v291_v44 = vsel %vm290_vm6, %v1240_v27, %v287_v40  ;;  %v302_v59 = vmul.f32 %v281_v41, %v1542_v57 }
 0x312   :  { %v296_v45 = vsel %vm293_vm7, %v295_v42, %v291_v44 }
 0x313   :  { %v1175_v46 = vadd.f32 -1.0, %v298_v43  ;;  %v299_v47 = vmul.f32 2.0, %v296_v45  ;;  %v303_v54 = vmul.f32 %v296_v45, %v1539_v52 }
 0x315   :  { %306 = vrot.lane.b32.xlu1 %v1175_v46, %s1476_s2  ;;  %v1176_v48 = vadd.f32 -1.0, %v299_v47 }
 0x317   :  { %308 = vrot.lane.b32.xlu0 %v1176_v48, %s1476_s2 }
 0x387   :  { %v307_v49 = vpop.permute.xlu1 %306 }
 0x388   :  { %v312_v50 = vmul.f32 %v307_v49, %v281_v41 }
 0x389   :  { %v309_v51 = vpop.permute.xlu0 %308 }
 0x38a   :  { %v313_v53 = vmul.f32 %v309_v51, %v296_v45  ;;  %316 = vrot.lane.b32.xlu0 %v312_v50, %s1476_s2 }
 0x38c   :  { %318 = vrot.lane.b32.xlu2 %v313_v53, %s1476_s2 }
 0x3e6   :  { %v319_v55 = vpop.permute.xlu2 %318 }
 0x3e7   :  { %v1561_v56 = vadd.f32 %v319_v55, %v303_v54 }
 0x3e9   :  { %1241 = vtanh.f32 %v1561_v56 }
 0x3ef   :  { %v1242_v58 = vpop.eup %1241 }
 0x3f0   :  { %330 = vrot.lane.b32.xlu1 %v1242_v58, %s1476_s2 }
 0x3fc   :  { %v317_v60 = vpop.permute.xlu0 %316 }
 0x3fd   :  { %v1566_v61 = vadd.f32 %v317_v60, %v302_v59 }
 0x3ff   :  { %1243 = vtanh.f32 %v1566_v61 }
 0x405   :  { %v1244_v62 = vpop.eup %1243 }
 0x406   :  { %328 = vrot.lane.b32.xlu2 %v1244_v62, %s1476_s2 }
 0x460   :  { %v329_v63 = vpop.permute.xlu2 %328 }
 0x461   :  { %v334_v52 = vmul.f32 %v329_v63, %v281_v41 }
 0x462   :  { %v331_v0 = vpop.permute.xlu1 %330 }
 0x463   :  { %v335_v1 = vmul.f32 %v331_v0, %v296_v45  ;;  %v352_v2 = vpack.c.bf16 %v334_v52, %v334_v52 }
 0x465   :  { %v340_v3 = vrot.slane %v335_v1, 7  ;;  %v353_v4 = vpack.c.bf16 %v335_v1, %v335_v1  ;;  %v356_v7 = vunpack.c.l.b16 %v352_v2 }
 0x467   :  { %v357_v5 = vunpack.c.l.b16 %v353_v4  ;;  %v341_v6 = vsel %vm212_vm10, %v340_v3, %v334_v52 }
 0x468   :  { %v342_v57 = vsel %vm214_vm11, %v340_v3, %v341_v6 }
 0x469   :  { %v358_v9 = vrot.slane %v357_v5, 7  ;;  %v343_v10 = vsel %vm216_vm12, %v340_v3, %v342_v57 }
 0x46a   :  { %v1574_v11 = vsel %vm218_vm13, %v340_v3, %v343_v10 }
 0x46b   :  { %v359_v12 = vsel %vm212_vm10, %v358_v9, %v356_v7 }
 0x46c   :  { %v360_v13 = vpack.c.b16 %v359_v12, %v359_v12 }
 0x46e   :  { %361 = vrot.lane.b32.xlu0 %v360_v13, %s1470_s29 }
 0x4e0   :  { %v362_v14 = vpop.permute.xlu0 %361 }
 0x4e1   :  { %1177 = vmatmul.msk.bf16.vlgmr.msra.gmra.mxu2 %vm98_vm1, %v362_v14 }
 0x564   :  { %v375_v17 = vpop.f32.mrf.mxu2 }
 0x565   :  { %v380_v18 = vrot.slane %v375_v17, 1  ;;  %v383_v19 = vadd.f32 %v375_v17, %v350_v15 }
 0x567   :  { %v384_v20 = vadd.f32 %v380_v18, %v351_v16  ;;  %v1178_v21 = vmul.f32 -1.442695, %v383_v19  ;;  %v473_v19 = vld [vmem:[#allocation4 + $0x3] sm:$0x1] }
 0x569   :  { %1245 = vpow2.f32 %v1178_v21  ;;  %v1179_v22 = vmul.f32 -1.442695, %v384_v20  ;;  %v474_v20 = vld [vmem:[#allocation4 + $0xb] sm:$0x1] }
 0x56b   :  { %1247 = vpow2.f32 %v1179_v22 }
 0x56c   :  { %v377_v23 = vpop.f32.mrf.mxu2 }
 0x56f   :  { %v1246_v24 = vpop.eup %1245 }
 0x570   :  { %v391_v25 = vadd.f32 1.0, %v1246_v24 }
 0x571   :  { %v1248_v26 = vpop.eup %1247 }
 0x572   :  { %v392_v27 = vadd.f32 1.0, %v1248_v26  ;;  %1249 = vrcp.f32 %v391_v25  ;;  %v404_v33 = vand.u32 2147483648, %v391_v25  ;;  %v402_v35 = vand.u32 2147483647, %v391_v25 }
 0x573   :  { %vm398_vm9 = vweird.f32 %v391_v25 }
 0x574   :  { %1251 = vrcp.f32 %v392_v27  ;;  %v419_v37 = vand.u32 2147483648, %v392_v27  ;;  %v417_v40 = vand.u32 2147483647, %v392_v27  ;;  %v405_v41 = vor.u32 1.1754944e-38, %v404_v33 }
 0x575   :  { %vm403_vm2 = vcmp.eq.f32.partialorder %v402_v35, 8.507059e+37  ;;  %vm413_vm3 = vweird.f32 %v392_v27 }
 0x576   :  { %v420_v45 = vor.u32 1.1754944e-38, %v419_v37  ;;  %vm418_vm5 = vcmp.eq.f32.partialorder %v417_v40, 8.507059e+37 }
 0x578   :  { %v1250_v28 = vpop.eup %1249 }
 0x579   :  { %v394_v29 = vmul.f32 %v1250_v28, %v391_v25  ;;  %vm399_vm8 = vweird.f32 %v1250_v28 }
 0x57a   :  { %v1252_v30 = vpop.eup %1251  ;;  %vm400_vm15 = vmor %vm398_vm9, %vm399_vm8 }
 0x57b   :  { %v395_v31 = vsub.f32 1.0, %v394_v29  ;;  %v409_v32 = vmul.f32 %v1252_v30, %v392_v27  ;;  %vm414_vm14 = vweird.f32 %v1252_v30 }
 0x57c   :  { %vm415_vm4 = vmor %vm413_vm3, %vm414_vm14 }
 0x57d   :  { %v396_v34 = vmul.f32 %v1250_v28, %v395_v31  ;;  %v410_v36 = vsub.f32 1.0, %v409_v32 }
 0x57f   :  { %v397_v38 = vadd.f32 %v1250_v28, %v396_v34  ;;  %v411_v39 = vmul.f32 %v1252_v30, %v410_v36 }
 0x581   :  { %v401_v42 = vsel %vm400_vm15, %v1250_v28, %v397_v38  ;;  %v412_v43 = vadd.f32 %v1252_v30, %v411_v39 }
 0x582   :  { %v406_v44 = vsel %vm403_vm2, %v405_v41, %v401_v42 }
 0x583   :  { %v423_v46 = vmul.f32 2.0, %v406_v44  ;;  %v416_v47 = vsel %vm415_vm4, %v1252_v30, %v412_v43  ;;  %v427_v59 = vmul.f32 %v406_v44, %v1566_v61 }
 0x584   :  { %v421_v48 = vsel %vm418_vm5, %v420_v45, %v416_v47 }
 0x585   :  { %v1180_v49 = vadd.f32 -1.0, %v423_v46  ;;  %v424_v50 = vmul.f32 2.0, %v421_v48  ;;  %v428_v52 = vmul.f32 %v421_v48, %v1561_v56 }
 0x587   :  { %431 = vrot.lane.b32.xlu2 %v1180_v49, %s1476_s2  ;;  %v1181_v51 = vadd.f32 -1.0, %v424_v50 }
 0x589   :  { %433 = vrot.lane.b32.xlu1 %v1181_v51, %s1476_s2 }
 0x5e1   :  { %v432_v53 = vpop.permute.xlu2 %431 }
 0x5e2   :  { %v437_v54 = vmul.f32 %v432_v53, %v406_v44 }
 0x5e4   :  { %441 = vrot.lane.b32.xlu1 %v437_v54, %s1476_s2 }
 0x5fb   :  { %v434_v55 = vpop.permute.xlu1 %433 }
 0x5fc   :  { %v438_v58 = vmul.f32 %v434_v55, %v421_v48 }
 0x5fe   :  { %443 = vrot.lane.b32.xlu0 %v438_v58, %s1476_s2 }
 0x656   :  { %v442_v60 = vpop.permute.xlu1 %441 }
 0x657   :  { %v1584_v62 = vadd.f32 %v442_v60, %v427_v59 }
 0x659   :  { %1253 = vtanh.f32 %v1584_v62 }
 0x65f   :  { %v1254_v63 = vpop.eup %1253 }
 0x660   :  { %453 = vrot.lane.b32.xlu0 %v1254_v63, %s1476_s2 }
 0x670   :  { %v444_v0 = vpop.permute.xlu0 %443 }
 0x671   :  { %v1589_v1 = vadd.f32 %v444_v0, %v428_v52 }
 0x673   :  { %1255 = vtanh.f32 %v1589_v1 }
 0x679   :  { %v1256_v2 = vpop.eup %1255 }
 0x67a   :  { %455 = vrot.lane.b32.xlu2 %v1256_v2, %s1476_s2 }
 0x6d2   :  { %v454_v3 = vpop.permute.xlu0 %453 }
 0x6d3   :  { %v459_v61 = vmul.f32 %v454_v3, %v406_v44 }
 0x6d4   :  { %v456_v4 = vpop.permute.xlu2 %455 }
 0x6d5   :  { %v460_v5 = vmul.f32 %v456_v4, %v421_v48  ;;  %v475_v6 = vpack.c.bf16 %v459_v61, %v459_v61 }
 0x6d7   :  { %v465_v57 = vrot.slane %v460_v5, 7  ;;  %v476_v7 = vpack.c.bf16 %v460_v5, %v460_v5  ;;  %v479_v12 = vunpack.c.l.b16 %v475_v6 }
 0x6d9   :  { %v466_v9 = vsel %vm212_vm10, %v465_v57, %v459_v61  ;;  %v480_v10 = vunpack.c.l.b16 %v476_v7 }
 0x6da   :  { %v467_v56 = vsel %vm214_vm11, %v465_v57, %v466_v9 }
 0x6db   :  { %v468_v13 = vsel %vm216_vm12, %v465_v57, %v467_v56  ;;  %v481_v14 = vrot.slane %v480_v10, 7 }
 0x6dc   :  { %v1597_v15 = vsel %vm218_vm13, %v465_v57, %v468_v13 }
 0x6dd   :  { %v482_v16 = vsel %vm212_vm10, %v481_v14, %v479_v12 }
 0x6de   :  { %v483_v17 = vpack.c.b16 %v482_v16, %v482_v16 }
 0x6e0   :  { %484 = vrot.lane.b32.xlu1 %v483_v17, %s1470_s29 }
 0x752   :  { %v485_v18 = vpop.permute.xlu1 %484 }
 0x753   :  { %1182 = vmatmul.msk.bf16.vlgmr.msra.gmra.mxu3 %vm98_vm1, %v485_v18 }
 0x7d6   :  { %v498_v21 = vpop.f32.mrf.mxu3 }
 0x7d7   :  { %v503_v22 = vrot.slane %v498_v21, 1  ;;  %v506_v23 = vadd.f32 %v498_v21, %v473_v19 }
 0x7d9   :  { %v507_v24 = vadd.f32 %v503_v22, %v474_v20  ;;  %v1183_v25 = vmul.f32 -1.442695, %v506_v23 }
 0x7db   :  { %1257 = vpow2.f32 %v1183_v25  ;;  %v1184_v26 = vmul.f32 -1.442695, %v507_v24  ;;  %v598_v24 = vld [vmem:[#allocation4 + $0x4] sm:$0x1]  ;;  %v599_v25 = vld [vmem:[#allocation4 + $0xc] sm:$0x1] }
 0x7dd   :  { %1259 = vpow2.f32 %v1184_v26 }
 0x7de   :  { %v500_v27 = vpop.f32.mrf.mxu3 }
 0x7e1   :  { %v1258_v28 = vpop.eup %1257 }
 0x7e2   :  { %v514_v29 = vadd.f32 1.0, %v1258_v28 }
 0x7e3   :  { %v1260_v30 = vpop.eup %1259 }
 0x7e4   :  { %v515_v31 = vadd.f32 1.0, %v1260_v30  ;;  %1261 = vrcp.f32 %v514_v29  ;;  %v527_v37 = vand.u32 2147483648, %v514_v29  ;;  %v525_v39 = vand.u32 2147483647, %v514_v29 }
 0x7e5   :  { %vm521_vm7 = vweird.f32 %v514_v29 }
 0x7e6   :  { %1263 = vrcp.f32 %v515_v31  ;;  %v542_v41 = vand.u32 2147483648, %v515_v31  ;;  %v540_v44 = vand.u32 2147483647, %v515_v31  ;;  %v528_v45 = vor.u32 1.1754944e-38, %v527_v37 }
 0x7e7   :  { %vm526_vm14 = vcmp.eq.f32.partialorder %v525_v39, 8.507059e+37  ;;  %vm536_vm15 = vweird.f32 %v515_v31 }
 0x7e8   :  { %v543_v49 = vor.u32 1.1754944e-38, %v542_v41  ;;  %vm541_vm3 = vcmp.eq.f32.partialorder %v540_v44, 8.507059e+37 }
 0x7ea   :  { %v1262_v32 = vpop.eup %1261 }
 0x7eb   :  { %v517_v33 = vmul.f32 %v1262_v32, %v514_v29  ;;  %vm522_vm6 = vweird.f32 %v1262_v32 }
 0x7ec   :  { %v1264_v34 = vpop.eup %1263  ;;  %vm523_vm9 = vmor %vm521_vm7, %vm522_vm6 }
 0x7ed   :  { %v518_v35 = vsub.f32 1.0, %v517_v33  ;;  %v532_v36 = vmul.f32 %v1264_v34, %v515_v31  ;;  %vm537_vm8 = vweird.f32 %v1264_v34 }
 0x7ee   :  { %vm538_vm2 = vmor %vm536_vm15, %vm537_vm8 }
 0x7ef   :  { %v519_v38 = vmul.f32 %v1262_v32, %v518_v35  ;;  %v533_v40 = vsub.f32 1.0, %v532_v36 }
 0x7f1   :  { %v520_v42 = vadd.f32 %v1262_v32, %v519_v38  ;;  %v534_v43 = vmul.f32 %v1264_v34, %v533_v40 }
 0x7f3   :  { %v524_v46 = vsel %vm523_vm9, %v1262_v32, %v520_v42  ;;  %v535_v47 = vadd.f32 %v1264_v34, %v534_v43 }
 0x7f4   :  { %v529_v48 = vsel %vm526_vm14, %v528_v45, %v524_v46 }
 0x7f5   :  { %v546_v50 = vmul.f32 2.0, %v529_v48  ;;  %v539_v51 = vsel %vm538_vm2, %v1264_v34, %v535_v47  ;;  %v550_v0 = vmul.f32 %v529_v48, %v1584_v62 }
 0x7f6   :  { %v544_v53 = vsel %vm541_vm3, %v543_v49, %v539_v51 }
 0x7f7   :  { %v1185_v54 = vadd.f32 -1.0, %v546_v50  ;;  %v547_v55 = vmul.f32 2.0, %v544_v53  ;;  %v551_v61 = vmul.f32 %v544_v53, %v1589_v1 }
 0x7f9   :  { %554 = vrot.lane.b32.xlu0 %v1185_v54, %s1476_s2  ;;  %v1186_v58 = vadd.f32 -1.0, %v547_v55 }
 0x7fb   :  { %556 = vrot.lane.b32.xlu2 %v1186_v58, %s1476_s2 }
 0x855   :  { %v557_v59 = vpop.permute.xlu2 %556 }
 0x856   :  { %v561_v60 = vmul.f32 %v557_v59, %v544_v53 }
 0x858   :  { %566 = vrot.lane.b32.xlu1 %v561_v60, %s1476_s2 }
 0x86b   :  { %v555_v63 = vpop.permute.xlu0 %554 }
 0x86c   :  { %v560_v52 = vmul.f32 %v555_v63, %v529_v48 }
 0x86e   :  { %564 = vrot.lane.b32.xlu2 %v560_v52, %s1476_s2 }
 0x8c8   :  { %v565_v2 = vpop.permute.xlu2 %564 }
 0x8c9   :  { %v1607_v3 = vadd.f32 %v565_v2, %v550_v0 }
 0x8ca   :  { %v567_v4 = vpop.permute.xlu1 %566 }
 0x8cb   :  { %1265 = vtanh.f32 %v1607_v3  ;;  %v1611_v5 = vadd.f32 %v567_v4, %v551_v61 }
 0x8cd   :  { %1267 = vtanh.f32 %v1611_v5 }
 0x8d1   :  { %v1266_v6 = vpop.eup %1265 }
 0x8d2   :  { %576 = vrot.lane.b32.xlu1 %v1266_v6, %s1476_s2 }
 0x8d3   :  { %v1268_v57 = vpop.eup %1267 }
 0x8d4   :  { %578 = vrot.lane.b32.xlu0 %v1268_v57, %s1476_s2 }
 0x944   :  { %v577_v7 = vpop.permute.xlu1 %576 }
 0x945   :  { %v582_v62 = vmul.f32 %v577_v7, %v529_v48 }
 0x946   :  { %v579_v9 = vpop.permute.xlu0 %578 }
 0x947   :  { %v583_v10 = vmul.f32 %v579_v9, %v544_v53  ;;  %v600_v56 = vpack.c.bf16 %v582_v62, %v582_v62 }
 0x949   :  { %v588_v12 = vrot.slane %v583_v10, 7  ;;  %v601_v1 = vpack.c.bf16 %v583_v10, %v583_v10  ;;  %v604_v17 = vunpack.c.l.b16 %v600_v56 }
 0x94b   :  { %v605_v13 = vunpack.c.l.b16 %v601_v1  ;;  %v589_v14 = vsel %vm212_vm10, %v588_v12, %v582_v62 }
 0x94c   :  { %v590_v16 = vsel %vm214_vm11, %v588_v12, %v589_v14 }
 0x94d   :  { %v606_v18 = vrot.slane %v605_v13, 7  ;;  %v591_v19 = vsel %vm216_vm12, %v588_v12, %v590_v16 }
 0x94e   :  { %v1620_v20 = vsel %vm218_vm13, %v588_v12, %v591_v19 }
 0x94f   :  { %v607_v21 = vsel %vm212_vm10, %v606_v18, %v604_v17 }
 0x950   :  { %v608_v22 = vpack.c.b16 %v607_v21, %v607_v21 }
 0x952   :  { %609 = vrot.lane.b32.xlu2 %v608_v22, %s1470_s29 }
 0x9ac   :  { %v610_v23 = vpop.permute.xlu2 %609 }
 0x9ad   :  { %1187 = vmatmul.msk.bf16.vlgmr.msrb.gmra.mxu0 %vm98_vm1, %v610_v23 }
 0xa2a   :  { %v623_v26 = vpop.f32.mrf.mxu0 }
 0xa2b   :  { %v628_v27 = vrot.slane %v623_v26, 1  ;;  %v631_v28 = vadd.f32 %v623_v26, %v598_v24 }
 0xa2d   :  { %v632_v29 = vadd.f32 %v628_v27, %v599_v25  ;;  %v1188_v30 = vmul.f32 -1.442695, %v631_v28 }
 0xa2f   :  { %1269 = vpow2.f32 %v1188_v30  ;;  %v1189_v31 = vmul.f32 -1.442695, %v632_v29  ;;  %v722_v30 = vld [vmem:[#allocation4 + $0x5] sm:$0x1] }
 0xa31   :  { %1271 = vpow2.f32 %v1189_v31  ;;  %v723_v31 = vld [vmem:[#allocation4 + $0xd] sm:$0x1] }
 0xa32   :  { %v625_v32 = vpop.f32.mrf.mxu0 }
 0xa35   :  { %v1270_v33 = vpop.eup %1269 }
 0xa36   :  { %v639_v34 = vadd.f32 1.0, %v1270_v33 }
 0xa37   :  { %v1272_v35 = vpop.eup %1271 }
 0xa38   :  { %v640_v36 = vadd.f32 1.0, %v1272_v35  ;;  %1273 = vrcp.f32 %v639_v34  ;;  %v652_v42 = vand.u32 2147483648, %v639_v34  ;;  %v650_v44 = vand.u32 2147483647, %v639_v34 }
 0xa39   :  { %vm646_vm5 = vweird.f32 %v639_v34 }
 0xa3a   :  { %1275 = vrcp.f32 %v640_v36  ;;  %v667_v46 = vand.u32 2147483648, %v640_v36  ;;  %v665_v49 = vand.u32 2147483647, %v640_v36  ;;  %v653_v50 = vor.u32 1.1754944e-38, %v652_v42 }
 0xa3b   :  { %vm651_vm8 = vcmp.eq.f32.partialorder %v650_v44, 8.507059e+37  ;;  %vm661_vm9 = vweird.f32 %v640_v36 }
 0xa3c   :  { %v668_v55 = vor.u32 1.1754944e-38, %v667_v46  ;;  %vm666_vm15 = vcmp.eq.f32.partialorder %v665_v49, 8.507059e+37 }
 0xa3e   :  { %v1274_v37 = vpop.eup %1273 }
 0xa3f   :  { %v642_v38 = vmul.f32 %v1274_v37, %v639_v34  ;;  %vm647_vm4 = vweird.f32 %v1274_v37 }
 0xa40   :  { %v1276_v39 = vpop.eup %1275  ;;  %vm648_vm7 = vmor %vm646_vm5, %vm647_vm4 }
 0xa41   :  { %v643_v40 = vsub.f32 1.0, %v642_v38  ;;  %v657_v41 = vmul.f32 %v1276_v39, %v640_v36  ;;  %vm662_vm6 = vweird.f32 %v1276_v39 }
 0xa42   :  { %vm663_vm14 = vmor %vm661_vm9, %vm662_vm6 }
 0xa43   :  { %v644_v43 = vmul.f32 %v1274_v37, %v643_v40  ;;  %v658_v45 = vsub.f32 1.0, %v657_v41 }
 0xa45   :  { %v645_v47 = vadd.f32 %v1274_v37, %v644_v43  ;;  %v659_v48 = vmul.f32 %v1276_v39, %v658_v45 }
 0xa47   :  { %v649_v51 = vsel %vm648_vm7, %v1274_v37, %v645_v47  ;;  %v660_v53 = vadd.f32 %v1276_v39, %v659_v48 }
 0xa48   :  { %v654_v54 = vsel %vm651_vm8, %v653_v50, %v649_v51 }
 0xa49   :  { %v671_v58 = vmul.f32 2.0, %v654_v54  ;;  %v664_v59 = vsel %vm663_vm14, %v1276_v39, %v660_v53  ;;  %v675_v10 = vmul.f32 %v654_v54, %v1607_v3 }
 0xa4a   :  { %v669_v60 = vsel %vm666_vm15, %v668_v55, %v664_v59 }
 0xa4b   :  { %v1190_v63 = vadd.f32 -1.0, %v671_v58  ;;  %v672_v52 = vmul.f32 2.0, %v669_v60  ;;  %v676_v57 = vmul.f32 %v669_v60, %v1611_v5 }
 0xa4d   :  { %679 = vrot.lane.b32.xlu1 %v1190_v63, %s1476_s2  ;;  %v1191_v0 = vadd.f32 -1.0, %v672_v52 }
 0xa4f   :  { %681 = vrot.lane.b32.xlu0 %v1191_v0, %s1476_s2 }
 0xabf   :  { %v680_v2 = vpop.permute.xlu1 %679 }
 0xac0   :  { %v685_v61 = vmul.f32 %v680_v2, %v654_v54 }
 0xac1   :  { %v682_v4 = vpop.permute.xlu0 %681 }
 0xac2   :  { %v686_v6 = vmul.f32 %v682_v4, %v669_v60  ;;  %689 = vrot.lane.b32.xlu0 %v685_v61, %s1476_s2 }
 0xac4   :  { %691 = vrot.lane.b32.xlu2 %v686_v6, %s1476_s2 }
 0xb1e   :  { %v692_v7 = vpop.permute.xlu2 %691 }
 0xb1f   :  { %v1630_v62 = vadd.f32 %v692_v7, %v676_v57 }
 0xb21   :  { %1277 = vtanh.f32 %v1630_v62 }
 0xb27   :  { %v1278_v9 = vpop.eup %1277 }
 0xb28   :  { %703 = vrot.lane.b32.xlu1 %v1278_v9, %s1476_s2 }
 0xb34   :  { %v690_v56 = vpop.permute.xlu0 %689 }
 0xb35   :  { %v1635_v12 = vadd.f32 %v690_v56, %v675_v10 }
 0xb37   :  { %1279 = vtanh.f32 %v1635_v12 }
 0xb3d   :  { %v1280_v1 = vpop.eup %1279 }
 0xb3e   :  { %701 = vrot.lane.b32.xlu2 %v1280_v1, %s1476_s2 }
 0xb98   :  { %v702_v13 = vpop.permute.xlu2 %701 }
 0xb99   :  { %v707_v5 = vmul.f32 %v702_v13, %v654_v54 }
 0xb9a   :  { %v704_v14 = vpop.permute.xlu1 %703 }
 0xb9b   :  { %v708_v16 = vmul.f32 %v704_v14, %v669_v60  ;;  %v724_v17 = vpack.c.bf16 %v707_v5, %v707_v5 }
 0xb9d   :  { %v713_v18 = vrot.slane %v708_v16, 7  ;;  %v725_v19 = vpack.c.bf16 %v708_v16, %v708_v16  ;;  %v728_v23 = vunpack.c.l.b16 %v724_v17 }
 0xb9f   :  { %v729_v21 = vunpack.c.l.b16 %v725_v19  ;;  %v714_v22 = vsel %vm212_vm10, %v713_v18, %v707_v5 }
 0xba0   :  { %v715_v3 = vsel %vm214_vm11, %v713_v18, %v714_v22 }
 0xba1   :  { %v730_v24 = vrot.slane %v729_v21, 7  ;;  %v716_v25 = vsel %vm216_vm12, %v713_v18, %v715_v3 }
 0xba2   :  { %v1643_v26 = vsel %vm218_vm13, %v713_v18, %v716_v25 }
 0xba3   :  { %v731_v27 = vsel %vm212_vm10, %v730_v24, %v728_v23 }
 0xba4   :  { %v732_v28 = vpack.c.b16 %v731_v27, %v731_v27 }
 0xba6   :  { %733 = vrot.lane.b32.xlu0 %v732_v28, %s1470_s29 }
 0xc18   :  { %v734_v29 = vpop.permute.xlu0 %733 }
 0xc19   :  { %1192 = vmatmul.msk.bf16.vlgmr.msrb.gmra.mxu1 %vm98_vm1, %v734_v29 }
 0xc96   :  { %v747_v32 = vpop.f32.mrf.mxu1 }
 0xc97   :  { %v752_v33 = vrot.slane %v747_v32, 1  ;;  %v755_v34 = vadd.f32 %v747_v32, %v722_v30 }
 0xc99   :  { %v756_v35 = vadd.f32 %v752_v33, %v723_v31  ;;  %v1193_v36 = vmul.f32 -1.442695, %v755_v34 }
 0xc9b   :  { %1281 = vpow2.f32 %v1193_v36  ;;  %v1194_v37 = vmul.f32 -1.442695, %v756_v35 }
 0xc9d   :  { %1283 = vpow2.f32 %v1194_v37  ;;  %v846_v37 = vld [vmem:[#allocation4 + $0x6] sm:$0x1] }
 0xc9e   :  { %v749_v38 = vpop.f32.mrf.mxu1 }
 0xc9f   :  { %v847_v38 = vld [vmem:[#allocation4 + $0xe] sm:$0x1] }
 0xca1   :  { %v1282_v39 = vpop.eup %1281 }
 0xca2   :  { %v763_v40 = vadd.f32 1.0, %v1282_v39 }
 0xca3   :  { %v1284_v41 = vpop.eup %1283 }
 0xca4   :  { %v764_v42 = vadd.f32 1.0, %v1284_v41  ;;  %1285 = vrcp.f32 %v763_v40  ;;  %v776_v48 = vand.u32 2147483648, %v763_v40  ;;  %v774_v50 = vand.u32 2147483647, %v763_v40 }
 0xca5   :  { %vm770_vm3 = vweird.f32 %v763_v40 }
 0xca6   :  { %1287 = vrcp.f32 %v764_v42  ;;  %v791_v53 = vand.u32 2147483648, %v764_v42  ;;  %v789_v58 = vand.u32 2147483647, %v764_v42  ;;  %v777_v59 = vor.u32 1.1754944e-38, %v776_v48 }
 0xca7   :  { %vm775_vm6 = vcmp.eq.f32.partialorder %v774_v50, 8.507059e+37  ;;  %vm785_vm7 = vweird.f32 %v764_v42 }
 0xca8   :  { %v792_v0 = vor.u32 1.1754944e-38, %v791_v53  ;;  %vm790_vm9 = vcmp.eq.f32.partialorder %v789_v58, 8.507059e+37 }
 0xcaa   :  { %v1286_v43 = vpop.eup %1285 }
 0xcab   :  { %v766_v44 = vmul.f32 %v1286_v43, %v763_v40  ;;  %vm771_vm2 = vweird.f32 %v1286_v43 }
 0xcac   :  { %v1288_v45 = vpop.eup %1287  ;;  %vm772_vm5 = vmor %vm770_vm3, %vm771_vm2 }
 0xcad   :  { %v767_v46 = vsub.f32 1.0, %v766_v44  ;;  %v781_v47 = vmul.f32 %v1288_v45, %v764_v42  ;;  %vm786_vm4 = vweird.f32 %v1288_v45 }
 0xcae   :  { %vm787_vm8 = vmor %vm785_vm7, %vm786_vm4 }
 0xcaf   :  { %v768_v49 = vmul.f32 %v1286_v43, %v767_v46  ;;  %v782_v51 = vsub.f32 1.0, %v781_v47 }
 0xcb1   :  { %v769_v54 = vadd.f32 %v1286_v43, %v768_v49  ;;  %v783_v55 = vmul.f32 %v1288_v45, %v782_v51 }
 0xcb3   :  { %v773_v60 = vsel %vm772_vm5, %v1286_v43, %v769_v54  ;;  %v784_v63 = vadd.f32 %v1288_v45, %v783_v55 }
 0xcb4   :  { %v778_v52 = vsel %vm775_vm6, %v777_v59, %v773_v60 }
 0xcb5   :  { %v795_v2 = vmul.f32 2.0, %v778_v52  ;;  %v788_v61 = vsel %vm787_vm8, %v1288_v45, %v784_v63  ;;  %v799_v13 = vmul.f32 %v778_v52, %v1635_v12 }
 0xcb6   :  { %v793_v4 = vsel %vm790_vm9, %v792_v0, %v788_v61 }
 0xcb7   :  { %v1195_v6 = vadd.f32 -1.0, %v795_v2  ;;  %v796_v57 = vmul.f32 2.0, %v793_v4  ;;  %v800_v17 = vmul.f32 %v793_v4, %v1630_v62 }
 0xcb9   :  { %803 = vrot.lane.b32.xlu2 %v1195_v6, %s1476_s2  ;;  %v1196_v7 = vadd.f32 -1.0, %v796_v57 }
 0xcbb   :  { %805 = vrot.lane.b32.xlu1 %v1196_v7, %s1476_s2 }
 0xd13   :  { %v804_v9 = vpop.permute.xlu2 %803 }
 0xd14   :  { %v809_v10 = vmul.f32 %v804_v9, %v778_v52 }
 0xd16   :  { %813 = vrot.lane.b32.xlu1 %v809_v10, %s1476_s2 }
 0xd2d   :  { %v806_v56 = vpop.permute.xlu1 %805 }
 0xd2e   :  { %v810_v1 = vmul.f32 %v806_v56, %v793_v4 }
 0xd30   :  { %815 = vrot.lane.b32.xlu0 %v810_v1, %s1476_s2 }
 0xd88   :  { %v814_v5 = vpop.permute.xlu1 %813 }
 0xd89   :  { %v1653_v14 = vadd.f32 %v814_v5, %v799_v13 }
 0xd8b   :  { %1289 = vtanh.f32 %v1653_v14 }
 0xd91   :  { %v1290_v16 = vpop.eup %1289 }
 0xd92   :  { %825 = vrot.lane.b32.xlu0 %v1290_v16, %s1476_s2 }
 0xda2   :  { %v816_v18 = vpop.permute.xlu0 %815 }
 0xda3   :  { %v1658_v19 = vadd.f32 %v816_v18, %v800_v17 }
 0xda5   :  { %1291 = vtanh.f32 %v1658_v19 }
 0xdab   :  { %v1292_v21 = vpop.eup %1291 }
 0xdac   :  { %827 = vrot.lane.b32.xlu2 %v1292_v21, %s1476_s2 }
 0xe04   :  { %v826_v22 = vpop.permute.xlu0 %825 }
 0xe05   :  { %v831_v12 = vmul.f32 %v826_v22, %v778_v52 }
 0xe06   :  { %v828_v3 = vpop.permute.xlu2 %827 }
 0xe07   :  { %v832_v23 = vmul.f32 %v828_v3, %v793_v4  ;;  %v848_v24 = vpack.c.bf16 %v831_v12, %v831_v12 }
 0xe09   :  { %v837_v25 = vrot.slane %v832_v23, 7  ;;  %v849_v27 = vpack.c.bf16 %v832_v23, %v832_v23  ;;  %v852_v30 = vunpack.c.l.b16 %v848_v24 }
 0xe0b   :  { %v853_v28 = vunpack.c.l.b16 %v849_v27  ;;  %v838_v29 = vsel %vm212_vm10, %v837_v25, %v831_v12 }
 0xe0c   :  { %v839_v62 = vsel %vm214_vm11, %v837_v25, %v838_v29 }
 0xe0d   :  { %v854_v31 = vrot.slane %v853_v28, 7  ;;  %v840_v32 = vsel %vm216_vm12, %v837_v25, %v839_v62 }
 0xe0e   :  { %v1666_v33 = vsel %vm218_vm13, %v837_v25, %v840_v32 }
 0xe0f   :  { %v855_v34 = vsel %vm212_vm10, %v854_v31, %v852_v30 }
 0xe10   :  { %v856_v35 = vpack.c.b16 %v855_v34, %v855_v34 }
 0xe12   :  { %857 = vrot.lane.b32.xlu1 %v856_v35, %s1470_s29 }
 0xe84   :  { %v858_v36 = vpop.permute.xlu1 %857 }
 0xe85   :  { %1197 = vmatmul.msk.bf16.vlgmr.msrb.gmra.mxu2 %vm98_vm1, %v858_v36 }
 0xf08   :  { %v871_v39 = vpop.f32.mrf.mxu2 }
 0xf09   :  { %v876_v40 = vrot.slane %v871_v39, 1  ;;  %v879_v41 = vadd.f32 %v871_v39, %v846_v37 }
 0xf0b   :  { %v880_v42 = vadd.f32 %v876_v40, %v847_v38  ;;  %v1198_v43 = vmul.f32 -1.442695, %v879_v41 }
 0xf0d   :  { %1293 = vpow2.f32 %v1198_v43  ;;  %v1199_v44 = vmul.f32 -1.442695, %v880_v42 }
 0xf0f   :  { %1295 = vpow2.f32 %v1199_v44 }
 0xf10   :  { %v873_v45 = vpop.f32.mrf.mxu2 }
 0xf11   :  { %v968_v45 = vld [vmem:[#allocation4 + $0x7] sm:$0x1] }
 0xf13   :  { %v1294_v46 = vpop.eup %1293 }
 0xf14   :  { %v887_v47 = vadd.f32 1.0, %v1294_v46  ;;  %v969_v46 = vld [vmem:[#allocation4 + $0xf] sm:$0x1] }
 0xf15   :  { %v1296_v48 = vpop.eup %1295 }
 0xf16   :  { %v888_v49 = vadd.f32 1.0, %v1296_v48  ;;  %1297 = vrcp.f32 %v887_v47  ;;  %v900_v58 = vand.u32 2147483648, %v887_v47  ;;  %v898_v60 = vand.u32 2147483647, %v887_v47 }
 0xf17   :  { %vm894_vm15 = vweird.f32 %v887_v47 }
 0xf18   :  { %1299 = vrcp.f32 %v888_v49  ;;  %v915_v52 = vand.u32 2147483648, %v888_v49  ;;  %v913_v61 = vand.u32 2147483647, %v888_v49  ;;  %v901_v4 = vor.u32 1.1754944e-38, %v900_v58 }
 0xf19   :  { %vm899_vm4 = vcmp.eq.f32.partialorder %v898_v60, 8.507059e+37  ;;  %vm909_vm5 = vweird.f32 %v888_v49 }
 0xf1a   :  { %v916_v9 = vor.u32 1.1754944e-38, %v915_v52  ;;  %vm914_vm7 = vcmp.eq.f32.partialorder %v913_v61, 8.507059e+37 }
 0xf1c   :  { %v1298_v50 = vpop.eup %1297 }
 0xf1d   :  { %v890_v51 = vmul.f32 %v1298_v50, %v887_v47  ;;  %vm895_vm14 = vweird.f32 %v1298_v50 }
 0xf1e   :  { %v1300_v53 = vpop.eup %1299  ;;  %vm896_vm3 = vmor %vm894_vm15, %vm895_vm14 }
 0xf1f   :  { %v891_v54 = vsub.f32 1.0, %v890_v51  ;;  %v905_v55 = vmul.f32 %v1300_v53, %v888_v49  ;;  %vm910_vm2 = vweird.f32 %v1300_v53 }
 0xf20   :  { %vm911_vm6 = vmor %vm909_vm5, %vm910_vm2  ;;  %vm348_vm5 = vcmask 517376  }
 0xf21   :  { %v892_v59 = vmul.f32 %v1298_v50, %v891_v54  ;;  %v906_v63 = vsub.f32 1.0, %v905_v55 }
 0xf23   :  { %v893_v0 = vadd.f32 %v1298_v50, %v892_v59  ;;  %v907_v2 = vmul.f32 %v1300_v53, %v906_v63 }
 0xf25   :  { %v897_v6 = vsel %vm896_vm3, %v1298_v50, %v893_v0  ;;  %v908_v57 = vadd.f32 %v1300_v53, %v907_v2 }
 0xf26   :  { %v902_v7 = vsel %vm899_vm4, %v901_v4, %v897_v6 }
 0xf27   :  { %v919_v10 = vmul.f32 2.0, %v902_v7  ;;  %v912_v56 = vsel %vm911_vm6, %v1300_v53, %v908_v57  ;;  %v923_v12 = vmul.f32 %v902_v7, %v1653_v14  ;;  %vm471_vm6 = vcmask 779776  }
 0xf28   :  { %v917_v1 = vsel %vm914_vm7, %v916_v9, %v912_v56 }
 0xf29   :  { %v1200_v13 = vadd.f32 -1.0, %v919_v10  ;;  %v920_v5 = vmul.f32 2.0, %v917_v1  ;;  %v924_v24 = vmul.f32 %v917_v1, %v1658_v19 }
 0xf2b   :  { %927 = vrot.lane.b32.xlu0 %v1200_v13, %s1476_s2  ;;  %v1201_v16 = vadd.f32 -1.0, %v920_v5 }
 0xf2d   :  { %929 = vrot.lane.b32.xlu2 %v1201_v16, %s1476_s2 }
 0xf87   :  { %v930_v17 = vpop.permute.xlu2 %929 }
 0xf88   :  { %v934_v18 = vmul.f32 %v930_v17, %v917_v1 }
 0xf8a   :  { %939 = vrot.lane.b32.xlu1 %v934_v18, %s1476_s2 }
 0xf9d   :  { %v928_v21 = vpop.permute.xlu0 %927 }
 0xf9e   :  { %v933_v22 = vmul.f32 %v928_v21, %v902_v7 }
 0xfa0   :  { %937 = vrot.lane.b32.xlu2 %v933_v22, %s1476_s2 }
 0xffa   :  { %v938_v3 = vpop.permute.xlu2 %937 }
 0xffb   :  { %v1676_v23 = vadd.f32 %v938_v3, %v923_v12 }
 0xffc   :  { %v940_v25 = vpop.permute.xlu1 %939 }
 0xffd   :  { %1301 = vtanh.f32 %v1676_v23  ;;  %v1680_v27 = vadd.f32 %v940_v25, %v924_v24 }
 0xfff   :  { %1303 = vtanh.f32 %v1680_v27 }
0x1003   :  { %v1302_v28 = vpop.eup %1301 }
0x1004   :  { %949 = vrot.lane.b32.xlu1 %v1302_v28, %s1476_s2 }
0x1005   :  { %v1304_v29 = vpop.eup %1303 }
0x1006   :  { %951 = vrot.lane.b32.xlu0 %v1304_v29, %s1476_s2 }
0x1076   :  { %v950_v62 = vpop.permute.xlu1 %949 }
0x1077   :  { %v955_v14 = vmul.f32 %v950_v62, %v902_v7 }
0x1078   :  { %v952_v30 = vpop.permute.xlu0 %951 }
0x1079   :  { %v956_v31 = vmul.f32 %v952_v30, %v917_v1  ;;  %v970_v32 = vpack.c.bf16 %v955_v14, %v955_v14 }
0x107b   :  { %v961_v34 = vrot.slane %v956_v31, 7  ;;  %v971_v19 = vpack.c.bf16 %v956_v31, %v956_v31  ;;  %v974_v38 = vunpack.c.l.b16 %v970_v32 }
0x107d   :  { %v962_v35 = vsel %vm212_vm10, %v961_v34, %v955_v14  ;;  %v975_v36 = vunpack.c.l.b16 %v971_v19 }
0x107e   :  { %v963_v37 = vsel %vm214_vm11, %v961_v34, %v962_v35 }
0x107f   :  { %v964_v39 = vsel %vm216_vm12, %v961_v34, %v963_v37  ;;  %v976_v40 = vrot.slane %v975_v36, 7 }
0x1080   :  { %v1689_v41 = vsel %vm218_vm13, %v961_v34, %v964_v39 }
0x1081   :  { %v977_v42 = vsel %vm212_vm10, %v976_v40, %v974_v38 }
0x1082   :  { %v978_v43 = vpack.c.b16 %v977_v42, %v977_v42 }
0x1084   :  { %979 = vrot.lane.b32.xlu2 %v978_v43, %s1470_s29 }
0x10de   :  { %v980_v44 = vpop.permute.xlu2 %979 }
0x10df   :  { %1202 = vmatmul.msk.bf16.vlgmr.msrb.gmra.mxu3 %vm98_vm1, %v980_v44 }
0x1162   :  { %v993_v47 = vpop.f32.mrf.mxu3 }
0x1163   :  { %v998_v48 = vrot.slane %v993_v47, 1  ;;  %v1001_v49 = vadd.f32 %v993_v47, %v968_v45 }
0x1165   :  { %v1002_v50 = vadd.f32 %v998_v48, %v969_v46  ;;  %v1203_v51 = vmul.f32 -1.442695, %v1001_v49 }
0x1167   :  { %1305 = vpow2.f32 %v1203_v51  ;;  %v1204_v53 = vmul.f32 -1.442695, %v1002_v50 }
0x1169   :  { %1307 = vpow2.f32 %v1204_v53 }
0x116a   :  { %v995_v54 = vpop.f32.mrf.mxu3 }
0x116d   :  { %v1306_v55 = vpop.eup %1305 }
0x116e   :  { %v1009_v58 = vadd.f32 1.0, %v1306_v55 }
0x116f   :  { %v1308_v59 = vpop.eup %1307 }
0x1170   :  { %v1010_v60 = vadd.f32 1.0, %v1308_v59  ;;  %1309 = vrcp.f32 %v1009_v58  ;;  %v1022_v4 = vand.u32 2147483648, %v1009_v58  ;;  %v1020_v57 = vand.u32 2147483647, %v1009_v58 }
0x1171   :  { %vm1016_vm8 = vweird.f32 %v1009_v58 }
0x1172   :  { %1311 = vrcp.f32 %v1010_v60  ;;  %v1037_v9 = vand.u32 2147483648, %v1010_v60  ;;  %v1035_v1 = vand.u32 2147483647, %v1010_v60  ;;  %v1023_v13 = vor.u32 1.1754944e-38, %v1022_v4 }
0x1173   :  { %vm1021_vm15 = vcmp.eq.f32.partialorder %v1020_v57, 8.507059e+37  ;;  %vm1031_vm2 = vweird.f32 %v1010_v60 }
0x1174   :  { %v1038_v18 = vor.u32 1.1754944e-38, %v1037_v9  ;;  %vm1036_vm4 = vcmp.eq.f32.partialorder %v1035_v1, 8.507059e+37 }
0x1176   :  { %v1310_v63 = vpop.eup %1309 }
0x1177   :  { %v1012_v52 = vmul.f32 %v1310_v63, %v1009_v58  ;;  %vm1017_vm1 = vweird.f32 %v1310_v63 }
0x1178   :  { %v1312_v0 = vpop.eup %1311  ;;  %vm1018_vm14 = vmor %vm1016_vm8, %vm1017_vm1 }
0x1179   :  { %v1013_v2 = vsub.f32 1.0, %v1012_v52  ;;  %v1027_v61 = vmul.f32 %v1312_v0, %v1010_v60  ;;  %vm1032_vm9 = vweird.f32 %v1312_v0 }
0x117a   :  { %vm1033_vm3 = vmor %vm1031_vm2, %vm1032_vm9 }
0x117b   :  { %v1014_v6 = vmul.f32 %v1310_v63, %v1013_v2  ;;  %v1028_v7 = vsub.f32 1.0, %v1027_v61 }
0x117d   :  { %v1015_v10 = vadd.f32 %v1310_v63, %v1014_v6  ;;  %v1029_v56 = vmul.f32 %v1312_v0, %v1028_v7 }
0x117f   :  { %v1019_v5 = vsel %vm1018_vm14, %v1310_v63, %v1015_v10  ;;  %v1030_v16 = vadd.f32 %v1312_v0, %v1029_v56 }
0x1180   :  { %v1024_v17 = vsel %vm1021_vm15, %v1023_v13, %v1019_v5 }
0x1181   :  { %v1041_v21 = vmul.f32 2.0, %v1024_v17  ;;  %v1034_v22 = vsel %vm1033_vm3, %v1312_v0, %v1030_v16  ;;  %v1045_v19 = vmul.f32 %v1024_v17, %v1676_v23 }
0x1182   :  { %v1039_v12 = vsel %vm1036_vm4, %v1038_v18, %v1034_v22 }
0x1183   :  { %v1205_v3 = vadd.f32 -1.0, %v1041_v21  ;;  %v1042_v24 = vmul.f32 2.0, %v1039_v12  ;;  %v1046_v30 = vmul.f32 %v1039_v12, %v1680_v27 }
0x1185   :  { %1049 = vrot.lane.b32.xlu1 %v1205_v3, %s1476_s2  ;;  %v1206_v25 = vadd.f32 -1.0, %v1042_v24 }
0x1187   :  { %1051 = vrot.lane.b32.xlu0 %v1206_v25, %s1476_s2 }
0x11f7   :  { %v1050_v28 = vpop.permute.xlu1 %1049 }
0x11f8   :  { %v1055_v29 = vmul.f32 %v1050_v28, %v1024_v17 }
0x11f9   :  { %v1052_v62 = vpop.permute.xlu0 %1051 }
0x11fa   :  { %v1056_v14 = vmul.f32 %v1052_v62, %v1039_v12  ;;  %1059 = vrot.lane.b32.xlu0 %v1055_v29, %s1476_s2 }
0x11fc   :  { %1061 = vrot.lane.b32.xlu2 %v1056_v14, %s1476_s2 }
0x1202   :  { %220 = vrot.lane.b32.xlu0 %v1551_v8, %s1470_s29 }
0x120a   :  { %842 = vrot.lane.b32.xlu0 %v1666_v33, %s1477_s3 }
0x1256   :  { %v1062_v31 = vpop.permute.xlu2 %1061 }
0x1257   :  { %v1066_v32 = vadd.f32 %v1062_v31, %v1046_v30 }
0x1259   :  { %1313 = vtanh.f32 %v1066_v32  ;;  %v1099_v36 = vrot.slane %v1066_v32, 7 }
0x125f   :  { %v1314_v34 = vpop.eup %1313 }
0x1260   :  { %1073 = vrot.lane.b32.xlu1 %v1314_v34, %s1476_s2 }
0x1268   :  { %718 = vrot.lane.b32.xlu1 %v1643_v26, %s1470_s29 }
0x126c   :  { %v1060_v35 = vpop.permute.xlu0 %1059 }
0x126d   :  { %v1065_v8 = vadd.f32 %v1060_v35, %v1045_v19 }
0x126f   :  { %1315 = vtanh.f32 %v1065_v8  ;;  %v1100_v37 = vsel %vm212_vm10, %v1099_v36, %v1065_v8 }
0x1274   :  { %v221_v33 = vpop.permute.xlu0 %220 }
0x1275   :  { %v1316_v38 = vpop.eup %1315  ;;  %224 = vst.msk [vmem:[#allocation10] sm:$0x3] %vm73_vm0, %v221_v33 }
0x1276   :  { %1071 = vrot.lane.b32.xlu2 %v1316_v38, %s1476_s2 }
0x127c   :  { %v843_v46 = vpop.permute.xlu0 %842 }
0x127e   :  { %345 = vrot.lane.b32.xlu2 %v1574_v11, %s1477_s3 }
0x1286   :  { %593 = vrot.lane.b32.xlu2 %v1620_v20, %s1476_s2 }
0x12d0   :  { %v1072_v26 = vpop.permute.xlu2 %1071 }
0x12d1   :  { %v1077_v39 = vmul.f32 %v1072_v26, %v1024_v17 }
0x12d2   :  { %v1074_v23 = vpop.permute.xlu1 %1073 }
0x12d3   :  { %v1078_v27 = vmul.f32 %v1074_v23, %v1039_v12 }
0x12d5   :  { %v1083_v40 = vrot.slane %v1078_v27, 7 }
0x12d7   :  { %v1084_v42 = vsel %vm212_vm10, %v1083_v40, %v1077_v39  ;;  %vm596_vm10 = vcmask 1042176  }
0x12d8   :  { %v346_v43 = vpop.permute.xlu2 %345  ;;  %v1085_v44 = vsel %vm214_vm11, %v1083_v40, %v1084_v42  ;;  %1093 = vrot.lane.b32.xlu1 %v1084_v42, %s1470_s29  ;;  %s1139_s29 = sshll.u32 %s1745_s6, 4  ;;  %s1140_s29 = int_to_ptr.hbm [resolvable:$true] %s1139_s29 }
0x12d9   :  { %349 = vst.msk [vmem:[#allocation10] sm:$0x3] %vm348_vm5, %v346_v43  ;;  %v1086_v11 = vsel %vm216_vm12, %v1083_v40, %v1085_v44 }
0x12da   :  { %v719_v45 = vpop.permute.xlu1 %718  ;;  %v1087_v20 = vsel %vm218_vm13, %v1083_v40, %v1086_v11  ;;  %472 = vst.msk [vmem:[#allocation10] sm:$0x3] %vm471_vm6, %v1597_v15 }
0x12db   :  { %721 = vst.msk [vmem:[#allocation10 + $0x2] sm:$0x3] %vm73_vm0, %v719_v45  ;;  %1088 = vrot.lane.b32.xlu0 %v1087_v20, %s1476_s2 }
0x12dc   :  { %845 = vst.msk [vmem:[#allocation10 + $0x2] sm:$0x3] %vm348_vm5, %v843_v46 }
0x12dd   :  { %967 = vst.msk [vmem:[#allocation10 + $0x2] sm:$0x3] %vm471_vm6, %v1689_v41 }
0x12e0   :  { %v594_v47 = vpop.permute.xlu2 %593  ;;  %1101 = vrot.lane.b32.xlu1 %v1100_v37, %s1477_s3 }
0x12e1   :  { %597 = vst.msk [vmem:[#allocation10] sm:$0x3] %vm596_vm10, %v594_v47 }
0x134a   :  { %v1094_v15 = vpop.permute.xlu1 %1093 }
0x134b   :  { %1096 = vst.msk [vmem:[#allocation2] sm:$0x3] %vm73_vm0, %v1094_v15 }
0x134c   :  { %1108 = vst.msk [vmem:[#allocation11] sm:$0x3] %vm73_vm0, %v1094_v15 }
0x134d   :  { %v1089_v41 = vpop.permute.xlu0 %1088  ;;  %1131 = dma.vmem_to_hbm [thread:$0]  %s1127_s17, 32, %s1129_s20, [#allocation12]  }
0x134e   :  { %1091 = vst.msk [vmem:[#allocation10 + $0x2] sm:$0x3] %vm596_vm10, %v1089_v41 }
0x134f   :  { %1120 = dma.vmem_to_hbm [thread:$0]  %s1116_s22, 64, %s1118_s25, [#allocation6]  }
0x1352   :  { %v1102_v48 = vpop.permute.xlu1 %1101 }
0x1353   :  { %1104 = vst.msk [vmem:[#allocation3] sm:$0x3] %vm73_vm0, %v1102_v48 }
0x1354   :  { %1109 = vst.msk [vmem:[#allocation13] sm:$0x3] %vm73_vm0, %v1102_v48 }
0x1355   :  { %1142 = dma.vmem_to_hbm [thread:$0]  %s1138_s26, 32, %s1140_s29, [#allocation12]  }
0x1356   :  { %1465 = dma.done.wait [#allocation6], 64  }
0x1357   :  { %1466 = vsyncadd [#allocation6], 4294967232 }
0x1358   :  { %1467 = dma.done.wait [#allocation12], 64  }
0x1359   :  { %1468 = vsyncadd [#allocation12], 4294967232 }
0x135a   :  { %1155 = vsyncpa [#allocation5], 1 }
0x135b   :  { %1156 = vsyncpa [#allocation8], 1 }
0x135c   :  { %1157 = vsyncpa [#allocation6], 1 }
0x135d   :  { %1158 = vsyncpa [#allocation12], 1 }

</bundles_post_ra>
